<compile_context>
chip_gen: v7x
topology: tpu7x:2x2x1
jax: 0.10.0
libtpu: 0.0.40
codegen_flags: <defaults>
</compile_context>

<pallas_src>
import functools

import jax
import jax.numpy as jnp
from jax import lax
from jax.experimental import pallas as pl
from jax.experimental.pallas import tpu as pltpu

# ----------------------------- configuration --------------------------------
IMG = 16                     # input spatial size
CIN = 3                      # RGB input channels (Swin expects 3)
PATCH = 4                    # patch-embed patch size (4x4 conv, stride 4)
GRID = IMG // PATCH          # 4x4 patch grid
WIN = GRID                   # window covers the whole grid (no shift)
N_TOK = GRID * GRID          # 16 tokens
EMBED = 32                   # embed dim (== swin.head.in_features here)
NUM_HEADS = 2
HEAD_DIM = EMBED // NUM_HEADS
MLP_HIDDEN = 4 * EMBED       # 128
NUM_CLASSES = 10
HEAD_PAD = 128               # lane-dense padded head width (sliced to 10 outside)
LANE = 128
EPS = 1e-5

# ---- weight slab (bf16) row layout: every block starts on a 16-row boundary ----
W_PATCH = 0                                    # (48, 32)
W_Q = W_PATCH + CIN * PATCH * PATCH            # 48   (32, 32)  attn scale folded in
W_K = W_Q + EMBED                              # 80   (32, 32)
W_V = W_K + EMBED                              # 112  (32, 32)
W_PROJ = W_V + EMBED                           # 144  (32, 32)
W_FC1 = W_PROJ + EMBED                         # 176  (32, 128)
W_FC2 = W_FC1 + EMBED                          # 208  (128, 32)
W_HEAD = W_FC2 + MLP_HIDDEN                    # 336  (32, 128)
W_ROWS = W_HEAD + EMBED                        # 368

# ---- vector slab (f32) row layout ----
V_RELBIAS = 0                                  # (H*N, N) rel-pos bias, 16-row aligned
V_MASK = V_RELBIAS + NUM_HEADS * N_TOK         # 32  (H, E) 0/1 head-column masks
V_PATCH_B = V_MASK + NUM_HEADS                 # 34
V_PE_G, V_PE_B = 35, 36
V_LN1_G, V_LN1_B = 37, 38
V_QB, V_KB, V_VB = 39, 40, 41
V_PROJ_B = 42
V_LN2_G, V_LN2_B = 43, 44
V_FC1_B = 45
V_FC2_B = 46
V_NORM_G, V_NORM_B = 47, 48
V_HEAD_B = 49
V_ROWS = 56                                    # padded to a multiple of 8

_VMEM = pl.BlockSpec(memory_space=pltpu.MemorySpace.VMEM)


# --------------------------- in-kernel helpers --------------------------------
def _layernorm(x, g, b):
    mean = jnp.mean(x, axis=-1, keepdims=True)
    var = jnp.mean((x - mean) ** 2, axis=-1, keepdims=True)
    return (x - mean) * lax.rsqrt(var + EPS) * g + b


def _erf(x):
    # Abramowitz & Stegun 7.1.26 (|err| < 1.5e-7): exact-erf GELU numerics
    # (matches torch.nn.GELU()) using only exp/abs/select/div — all Mosaic-safe.
    p = 0.3275911
    a1, a2, a3, a4, a5 = (0.254829592, -0.284496736, 1.421413741,
                          -1.453152027, 1.061405429)
    sign = jnp.where(x >= 0.0, 1.0, -1.0)
    ax = jnp.abs(x)
    t = 1.0 / (1.0 + p * ax)
    poly = ((((a5 * t + a4) * t + a3) * t + a2) * t + a1) * t
    return sign * (1.0 - poly * jnp.exp(-ax * ax))


def _gelu(x):
    return 0.5 * x * (1.0 + _erf(x * 0.7071067811865476))


# ------------------------------ fused kernel ----------------------------------
def _fused_forward_kernel(patches_ref, w_ref, v_ref, out_ref, *, batch):
    f32, bf16 = jnp.float32, jnp.bfloat16
    BN = batch * N_TOK

    def vec(row, width=EMBED):                 # one f32 (1, width) parameter row
        return v_ref[row:row + 1, 0:width]

    def wblk(r0, rows, cols):                  # bf16 weight block (lane offset 0)
        return w_ref[r0:r0 + rows, 0:cols]

    def mm(a_bf, b_bf):                        # bf16 x bf16 -> f32 accumulate
        return jnp.dot(a_bf, b_bf, preferred_element_type=f32)

    # ---- patch embed (Conv2d(k=s=4) as matmul) + LayerNorm ----
    tok = mm(patches_ref[...].astype(bf16),
             wblk(W_PATCH, CIN * PATCH * PATCH, EMBED)) + vec(V_PATCH_B)
    tok = _layernorm(tok, vec(V_PE_G), vec(V_PE_B))

    # ---- W-MSA block: LN -> windowed MHA (+ rel-pos bias) -> residual ----
    shortcut = tok
    h = _layernorm(tok, vec(V_LN1_G), vec(V_LN1_B))
    h_bf = h.astype(bf16)
    q_all = mm(h_bf, wblk(W_Q, EMBED, EMBED)) + vec(V_QB)   # scale pre-folded
    k_all = mm(h_bf, wblk(W_K, EMBED, EMBED)) + vec(V_KB)
    v_all = mm(h_bf, wblk(W_V, EMBED, EMBED)) + vec(V_VB)

    head_mask = [vec(V_MASK + hd) for hd in range(NUM_HEADS)]             # (1, E)
    rel_bias = [v_ref[V_RELBIAS + hd * N_TOK:V_RELBIAS + (hd + 1) * N_TOK, 0:N_TOK]
                for hd in range(NUM_HEADS)]                               # (N, N)

    # Scores for every (batch, head) via head-column masking (no lane extracts),
    # stacked along sublanes -> a single softmax pass over (B*H*N, N).
    score_blocks = []
    for b in range(batch):
        r0 = b * N_TOK
        qb = q_all[r0:r0 + N_TOK, :]
        kb_bf = k_all[r0:r0 + N_TOK, :].astype(bf16)
        for hd in range(NUM_HEADS):
            qm = (qb * head_mask[hd]).astype(bf16)          # zero other-head cols
            s = lax.dot_general(qm, kb_bf, (((1,), (1,)), ((), ())),
                                preferred_element_type=f32)  # q_h @ k_h^T
            score_blocks.append(s + rel_bias[hd])
    S = jnp.concatenate(score_blocks, axis=0)                # (B*H*N, N) f32
    S = S - jnp.max(S, axis=-1, keepdims=True)
    P = jnp.exp(S)
    P = P / jnp.sum(P, axis=-1, keepdims=True)               # exact division

    # P @ V with the head concat folded into masked per-head accumulation.
    attn_rows = []
    for b in range(batch):
        r0 = b * N_TOK
        vb = v_all[r0:r0 + N_TOK, :]
        acc = jnp.zeros((N_TOK, EMBED), f32)
        for hd in range(NUM_HEADS):
            p0 = (b * NUM_HEADS + hd) * N_TOK
            p_bh = P[p0:p0 + N_TOK, :].astype(bf16)
            acc = acc + mm(p_bh, (vb * head_mask[hd]).astype(bf16))
        attn_rows.append(acc)                                # (N, E), heads summed in place
    attn = jnp.concatenate(attn_rows, axis=0)                # (B*N, E)

    h = mm(attn.astype(bf16), wblk(W_PROJ, EMBED, EMBED)) + vec(V_PROJ_B)
    tok = shortcut + h

    # ---- MLP: LN -> fc1 -> GELU -> fc2 -> residual ----
    shortcut = tok
    h = _layernorm(tok, vec(V_LN2_G), vec(V_LN2_B))
    h = mm(h.astype(bf16), wblk(W_FC1, EMBED, MLP_HIDDEN)) + vec(V_FC1_B, MLP_HIDDEN)
    h = _gelu(h)                                             # f32 elementwise
    h = mm(h.astype(bf16), wblk(W_FC2, MLP_HIDDEN, EMBED)) + vec(V_FC2_B)
    tok = shortcut + h

    # ---- swin.norm ----
    tok = _layernorm(tok, vec(V_NORM_G), vec(V_NORM_B))

    # ---- permute(0,3,1,2) + AdaptiveAvgPool2d(1) + flatten == per-batch token
    #      mean, expressed as one matmul against an iota-built averaging matrix.
    out_rows = out_ref.shape[0]
    row_id = lax.broadcasted_iota(jnp.int32, (out_rows, BN), 0)
    col_id = lax.broadcasted_iota(jnp.int32, (out_rows, BN), 1)
    lo = row_id * N_TOK
    avg = jnp.where(jnp.logical_and(col_id >= lo, col_id < lo + N_TOK),
                    1.0 / N_TOK, 0.0).astype(f32)            # (out_rows, B*N)
    pooled = jnp.dot(avg, tok, preferred_element_type=f32)   # (out_rows, E) f32

    # ---- new_heads Linear; (8, 128) lane- and sublane-dense unmasked store ----
    logits = mm(pooled.astype(bf16), wblk(W_HEAD, EMBED, HEAD_PAD)) + vec(V_HEAD_B, HEAD_PAD)
    out_ref[...] = logits.astype(out_ref.dtype)


# ------------------------------ glue / params ---------------------------------
def extract_patches(x, patch):
    """NCHW -> [B, num_patches, Cin*patch*patch] with (c, kh, kw) flatten order
    (matches Conv2d(kernel=stride=patch) weight flattening)."""
    B, C, H, W = x.shape
    nh, nw = H // patch, W // patch
    x = x.reshape(B, C, nh, patch, nw, patch)
    x = x.transpose(0, 2, 4, 1, 3, 5)        # B, nh, nw, C, ph, pw
    return x.reshape(B, nh * nw, C * patch * patch)


def make_rel_bias(table):
    """Standard Swin relative-position bias: table[(2W-1)^2, H] -> [H, N, N]."""
    coords = jnp.stack(
        jnp.meshgrid(jnp.arange(WIN), jnp.arange(WIN), indexing="ij"), axis=0)
    flat = coords.reshape(2, -1)
    rel = flat[:, :, None] - flat[:, None, :] + (WIN - 1)
    idx = rel[0] * (2 * WIN - 1) + rel[1]              # (N, N)
    return table[idx].transpose(2, 0, 1)               # (H, N, N)


def init_params(key):
    def nrm(k, shape, scale=0.02):
        return scale * jax.random.normal(k, shape, dtype=jnp.float32)

    ks = jax.random.split(key, 16)
    return {
        "patch_w": nrm(ks[0], (CIN * PATCH * PATCH, EMBED)),
        "patch_b": jnp.zeros((EMBED,), jnp.float32),
        "pe_ln_g": jnp.ones((EMBED,), jnp.float32),
        "pe_ln_b": jnp.zeros((EMBED,), jnp.float32),
        "ln1_g": jnp.ones((EMBED,), jnp.float32),
        "ln1_b": jnp.zeros((EMBED,), jnp.float32),
        "qkv_w": nrm(ks[1], (EMBED, 3 * EMBED)),
        "qkv_b": jnp.zeros((3 * EMBED,), jnp.float32),
        "proj_w": nrm(ks[2], (EMBED, EMBED)),
        "proj_b": jnp.zeros((EMBED,), jnp.float32),
        "rel_bias": make_rel_bias(nrm(ks[3], ((2 * WIN - 1) ** 2, NUM_HEADS))),
        "ln2_g": jnp.ones((EMBED,), jnp.float32),
        "ln2_b": jnp.zeros((EMBED,), jnp.float32),
        "fc1_w": nrm(ks[4], (EMBED, MLP_HIDDEN)),
        "fc1_b": jnp.zeros((MLP_HIDDEN,), jnp.float32),
        "fc2_w": nrm(ks[5], (MLP_HIDDEN, EMBED)),
        "fc2_b": jnp.zeros((EMBED,), jnp.float32),
        "norm_g": jnp.ones((EMBED,), jnp.float32),
        "norm_b": jnp.zeros((EMBED,), jnp.float32),
        "head_w": nrm(ks[6], (EMBED, NUM_CLASSES)),
        "head_b": jnp.zeros((NUM_CLASSES,), jnp.float32),
    }


def prepare_params(p):
    """One-time prep: fold the attention scale into q, pad the head to 128
    lanes, and pack everything into two contiguous slabs (bf16 weights + f32
    vectors/bias/rel-bias/masks) so the kernel issues only 3 input DMAs."""
    scale = float(HEAD_DIM) ** -0.5
    wq = p["qkv_w"][:, :EMBED] * scale
    wk = p["qkv_w"][:, EMBED:2 * EMBED]
    wv = p["qkv_w"][:, 2 * EMBED:]
    qb = p["qkv_b"][:EMBED] * scale
    kb = p["qkv_b"][EMBED:2 * EMBED]
    vb = p["qkv_b"][2 * EMBED:]
    head_w = jnp.zeros((EMBED, HEAD_PAD), jnp.float32).at[:, :NUM_CLASSES].set(p["head_w"])
    head_b = jnp.zeros((HEAD_PAD,), jnp.float32).at[:NUM_CLASSES].set(p["head_b"])

    # ---- weight slab (row-stacked, 128-lane, cast to bf16 for the MXU) ----
    def put(slab, r0, m):
        return slab.at[r0:r0 + m.shape[0], :m.shape[1]].set(m)

    wslab = jnp.zeros((W_ROWS, LANE), jnp.float32)
    wslab = put(wslab, W_PATCH, p["patch_w"])
    wslab = put(wslab, W_Q, wq)
    wslab = put(wslab, W_K, wk)
    wslab = put(wslab, W_V, wv)
    wslab = put(wslab, W_PROJ, p["proj_w"])
    wslab = put(wslab, W_FC1, p["fc1_w"])
    wslab = put(wslab, W_FC2, p["fc2_w"])
    wslab = put(wslab, W_HEAD, head_w)
    wslab = wslab.astype(jnp.bfloat16)

    # ---- vector slab (f32: rel-pos bias, head masks, all biases / LN params) ----
    def putv(slab, r, v):
        return slab.at[r, :v.shape[0]].set(v)

    vslab = jnp.zeros((V_ROWS, LANE), jnp.float32)
    rel = p["rel_bias"].reshape(NUM_HEADS * N_TOK, N_TOK)
    vslab = vslab.at[V_RELBIAS:V_RELBIAS + NUM_HEADS * N_TOK, :N_TOK].set(rel)
    masks = jnp.zeros((NUM_HEADS, EMBED), jnp.float32)
    for hd in range(NUM_HEADS):
        masks = masks.at[hd, hd * HEAD_DIM:(hd + 1) * HEAD_DIM].set(1.0)
    vslab = vslab.at[V_MASK:V_MASK + NUM_HEADS, :EMBED].set(masks)
    vslab = putv(vslab, V_PATCH_B, p["patch_b"])
    vslab = putv(vslab, V_PE_G, p["pe_ln_g"]); vslab = putv(vslab, V_PE_B, p["pe_ln_b"])
    vslab = putv(vslab, V_LN1_G, p["ln1_g"]); vslab = putv(vslab, V_LN1_B, p["ln1_b"])
    vslab = putv(vslab, V_QB, qb); vslab = putv(vslab, V_KB, kb); vslab = putv(vslab, V_VB, vb)
    vslab = putv(vslab, V_PROJ_B, p["proj_b"])
    vslab = putv(vslab, V_LN2_G, p["ln2_g"]); vslab = putv(vslab, V_LN2_B, p["ln2_b"])
    vslab = putv(vslab, V_FC1_B, p["fc1_b"])
    vslab = putv(vslab, V_FC2_B, p["fc2_b"])
    vslab = putv(vslab, V_NORM_G, p["norm_g"]); vslab = putv(vslab, V_NORM_B, p["norm_b"])
    vslab = putv(vslab, V_HEAD_B, head_b)
    return wslab, vslab


# ------------------------------ forward pass ----------------------------------
@jax.jit
def swin_transformer_self_forward(x, wslab, vslab):
    B = x.shape[0]
    patches = extract_patches(x, PATCH).reshape(B * N_TOK, CIN * PATCH * PATCH)
    out_rows = max(8, ((B + 7) // 8) * 8)          # sublane-dense output store
    out_pad = pl.pallas_call(
        functools.partial(_fused_forward_kernel, batch=B),
        out_shape=jax.ShapeDtypeStruct((out_rows, HEAD_PAD), jnp.float32),
        in_specs=[_VMEM, _VMEM, _VMEM],
        out_specs=_VMEM,
    )(patches, wslab, vslab)
    return out_pad[:B, :NUM_CLASSES]               # (B, num_classes)


# --------------------------------- main ---------------------------------------
if __name__ == "__main__":
    key = jax.random.PRNGKey(0)
    k_x, k_p = jax.random.split(key)
    x = jax.random.normal(k_x, (2, CIN, IMG, IMG), dtype=jnp.float32)  # NCHW
    wslab, vslab = prepare_params(init_params(k_p))

    out = swin_transformer_self_forward(x, wslab, vslab)
    out = jax.block_until_ready(out)
    assert out.shape == (2, NUM_CLASSES), out.shape
    assert bool(jnp.all(jnp.isfinite(out)))
    print("KERNEL_OK")
</pallas_src>

<mosaic_0001>
module attributes {stable_mosaic.version = 11 : i64} {
  func.func @_fused_forward_kernel(%arg0: memref<32x48xf32, #tpu.memory_space<vmem>>, %arg1: memref<368x128xbf16, #tpu.memory_space<vmem>>, %arg2: memref<56x128xf32, #tpu.memory_space<vmem>>, %arg3: memref<8x128xf32, #tpu.memory_space<vmem>>) attributes {dimension_semantics = [], scalar_prefetch = 0 : i64, scratch_operands = 0 : i64, tpu.core_type = #tpu.core_type<tc>} {
    %c0 = arith.constant 0 : index
    %c0_0 = arith.constant 0 : index
    %0 = vector.load %arg0[%c0, %c0_0] : memref<32x48xf32, #tpu.memory_space<vmem>>, vector<32x48xf32>
    %1 = arith.truncf %0 : vector<32x48xf32> to vector<32x48xbf16>
    %c0_1 = arith.constant 0 : index
    %c0_2 = arith.constant 0 : index
    %2 = vector.load %arg1[%c0_1, %c0_2] : memref<368x128xbf16, #tpu.memory_space<vmem>>, vector<48x32xbf16>
    %cst = arith.constant dense<0.000000e+00> : vector<32x32xf32>
    %3 = tpu.matmul %1, %2, %cst {dimension_numbers = #tpu.dot_dimension_numbers<[1], [0], [0], [1], [0, 0, 1, 1], [], []>} : vector<32x48xbf16>, vector<48x32xbf16>, vector<32x32xf32> -> vector<32x32xf32>
    %c34 = arith.constant 34 : index
    %c0_3 = arith.constant 0 : index
    %4 = vector.load %arg2[%c34, %c0_3] : memref<56x128xf32, #tpu.memory_space<vmem>>, vector<1x32xf32>
    %5 = vector.broadcast %4 : vector<1x32xf32> to vector<32x32xf32>
    %6 = arith.addf %3, %5 : vector<32x32xf32>
    %c35 = arith.constant 35 : index
    %c0_4 = arith.constant 0 : index
    %7 = vector.load %arg2[%c35, %c0_4] : memref<56x128xf32, #tpu.memory_space<vmem>>, vector<1x32xf32>
    %c36 = arith.constant 36 : index
    %c0_5 = arith.constant 0 : index
    %8 = vector.load %arg2[%c36, %c0_5] : memref<56x128xf32, #tpu.memory_space<vmem>>, vector<1x32xf32>
    %cst_6 = arith.constant dense<0.000000e+00> : vector<32xf32>
    %9 = vector.multi_reduction <add>, %6, %cst_6 [1] : vector<32x32xf32> to vector<32xf32>
    %10 = vector.shape_cast %9 : vector<32xf32> to vector<32x1xf32>
    %cst_7 = arith.constant 3.200000e+01 : f32
    %11 = vector.broadcast %cst_7 : f32 to vector<32x1xf32>
    %12 = arith.divf %10, %11 : vector<32x1xf32>
    %13 = vector.broadcast %12 : vector<32x1xf32> to vector<32x32xf32>
    %14 = arith.subf %6, %13 : vector<32x32xf32>
    %15 = arith.mulf %14, %14 : vector<32x32xf32>
    %cst_8 = arith.constant dense<0.000000e+00> : vector<32xf32>
    %16 = vector.multi_reduction <add>, %15, %cst_8 [1] : vector<32x32xf32> to vector<32xf32>
    %17 = vector.shape_cast %16 : vector<32xf32> to vector<32x1xf32>
    %cst_9 = arith.constant 3.200000e+01 : f32
    %18 = vector.broadcast %cst_9 : f32 to vector<32x1xf32>
    %19 = arith.divf %17, %18 : vector<32x1xf32>
    %20 = vector.broadcast %12 : vector<32x1xf32> to vector<32x32xf32>
    %21 = arith.subf %6, %20 : vector<32x32xf32>
    %cst_10 = arith.constant 9.99999974E-6 : f32
    %22 = vector.broadcast %cst_10 : f32 to vector<32x1xf32>
    %23 = arith.addf %19, %22 : vector<32x1xf32>
    %24 = math.rsqrt %23 : vector<32x1xf32>
    %25 = vector.broadcast %24 : vector<32x1xf32> to vector<32x32xf32>
    %26 = arith.mulf %21, %25 : vector<32x32xf32>
    %27 = vector.broadcast %7 : vector<1x32xf32> to vector<32x32xf32>
    %28 = arith.mulf %26, %27 : vector<32x32xf32>
    %29 = vector.broadcast %8 : vector<1x32xf32> to vector<32x32xf32>
    %30 = arith.addf %28, %29 : vector<32x32xf32>
    %c37 = arith.constant 37 : index
    %c0_11 = arith.constant 0 : index
    %31 = vector.load %arg2[%c37, %c0_11] : memref<56x128xf32, #tpu.memory_space<vmem>>, vector<1x32xf32>
    %c38 = arith.constant 38 : index
    %c0_12 = arith.constant 0 : index
    %32 = vector.load %arg2[%c38, %c0_12] : memref<56x128xf32, #tpu.memory_space<vmem>>, vector<1x32xf32>
    %cst_13 = arith.constant dense<0.000000e+00> : vector<32xf32>
    %33 = vector.multi_reduction <add>, %30, %cst_13 [1] : vector<32x32xf32> to vector<32xf32>
    %34 = vector.shape_cast %33 : vector<32xf32> to vector<32x1xf32>
    %cst_14 = arith.constant 3.200000e+01 : f32
    %35 = vector.broadcast %cst_14 : f32 to vector<32x1xf32>
    %36 = arith.divf %34, %35 : vector<32x1xf32>
    %37 = vector.broadcast %36 : vector<32x1xf32> to vector<32x32xf32>
    %38 = arith.subf %30, %37 : vector<32x32xf32>
    %39 = arith.mulf %38, %38 : vector<32x32xf32>
    %cst_15 = arith.constant dense<0.000000e+00> : vector<32xf32>
    %40 = vector.multi_reduction <add>, %39, %cst_15 [1] : vector<32x32xf32> to vector<32xf32>
    %41 = vector.shape_cast %40 : vector<32xf32> to vector<32x1xf32>
    %cst_16 = arith.constant 3.200000e+01 : f32
    %42 = vector.broadcast %cst_16 : f32 to vector<32x1xf32>
    %43 = arith.divf %41, %42 : vector<32x1xf32>
    %44 = vector.broadcast %36 : vector<32x1xf32> to vector<32x32xf32>
    %45 = arith.subf %30, %44 : vector<32x32xf32>
    %cst_17 = arith.constant 9.99999974E-6 : f32
    %46 = vector.broadcast %cst_17 : f32 to vector<32x1xf32>
    %47 = arith.addf %43, %46 : vector<32x1xf32>
    %48 = math.rsqrt %47 : vector<32x1xf32>
    %49 = vector.broadcast %48 : vector<32x1xf32> to vector<32x32xf32>
    %50 = arith.mulf %45, %49 : vector<32x32xf32>
    %51 = vector.broadcast %31 : vector<1x32xf32> to vector<32x32xf32>
    %52 = arith.mulf %50, %51 : vector<32x32xf32>
    %53 = vector.broadcast %32 : vector<1x32xf32> to vector<32x32xf32>
    %54 = arith.addf %52, %53 : vector<32x32xf32>
    %55 = arith.truncf %54 : vector<32x32xf32> to vector<32x32xbf16>
    %c48 = arith.constant 48 : index
    %c0_18 = arith.constant 0 : index
    %56 = vector.load %arg1[%c48, %c0_18] : memref<368x128xbf16, #tpu.memory_space<vmem>>, vector<32x32xbf16>
    %cst_19 = arith.constant dense<0.000000e+00> : vector<32x32xf32>
    %57 = tpu.matmul %55, %56, %cst_19 {dimension_numbers = #tpu.dot_dimension_numbers<[1], [0], [0], [1], [0, 0, 1, 1], [], []>} : vector<32x32xbf16>, vector<32x32xbf16>, vector<32x32xf32> -> vector<32x32xf32>
    %c39 = arith.constant 39 : index
    %c0_20 = arith.constant 0 : index
    %58 = vector.load %arg2[%c39, %c0_20] : memref<56x128xf32, #tpu.memory_space<vmem>>, vector<1x32xf32>
    %59 = vector.broadcast %58 : vector<1x32xf32> to vector<32x32xf32>
    %60 = arith.addf %57, %59 : vector<32x32xf32>
    %c80 = arith.constant 80 : index
    %c0_21 = arith.constant 0 : index
    %61 = vector.load %arg1[%c80, %c0_21] : memref<368x128xbf16, #tpu.memory_space<vmem>>, vector<32x32xbf16>
    %cst_22 = arith.constant dense<0.000000e+00> : vector<32x32xf32>
    %62 = tpu.matmul %55, %61, %cst_22 {dimension_numbers = #tpu.dot_dimension_numbers<[1], [0], [0], [1], [0, 0, 1, 1], [], []>} : vector<32x32xbf16>, vector<32x32xbf16>, vector<32x32xf32> -> vector<32x32xf32>
    %c40 = arith.constant 40 : index
    %c0_23 = arith.constant 0 : index
    %63 = vector.load %arg2[%c40, %c0_23] : memref<56x128xf32, #tpu.memory_space<vmem>>, vector<1x32xf32>
    %64 = vector.broadcast %63 : vector<1x32xf32> to vector<32x32xf32>
    %65 = arith.addf %62, %64 : vector<32x32xf32>
    %c112 = arith.constant 112 : index
    %c0_24 = arith.constant 0 : index
    %66 = vector.load %arg1[%c112, %c0_24] : memref<368x128xbf16, #tpu.memory_space<vmem>>, vector<32x32xbf16>
    %cst_25 = arith.constant dense<0.000000e+00> : vector<32x32xf32>
    %67 = tpu.matmul %55, %66, %cst_25 {dimension_numbers = #tpu.dot_dimension_numbers<[1], [0], [0], [1], [0, 0, 1, 1], [], []>} : vector<32x32xbf16>, vector<32x32xbf16>, vector<32x32xf32> -> vector<32x32xf32>
    %c41 = arith.constant 41 : index
    %c0_26 = arith.constant 0 : index
    %68 = vector.load %arg2[%c41, %c0_26] : memref<56x128xf32, #tpu.memory_space<vmem>>, vector<1x32xf32>
    %69 = vector.broadcast %68 : vector<1x32xf32> to vector<32x32xf32>
    %70 = arith.addf %67, %69 : vector<32x32xf32>
    %c32 = arith.constant 32 : index
    %c0_27 = arith.constant 0 : index
    %71 = vector.load %arg2[%c32, %c0_27] : memref<56x128xf32, #tpu.memory_space<vmem>>, vector<1x32xf32>
    %c33 = arith.constant 33 : index
    %c0_28 = arith.constant 0 : index
    %72 = vector.load %arg2[%c33, %c0_28] : memref<56x128xf32, #tpu.memory_space<vmem>>, vector<1x32xf32>
    %c0_29 = arith.constant 0 : index
    %c0_30 = arith.constant 0 : index
    %73 = vector.load %arg2[%c0_29, %c0_30] : memref<56x128xf32, #tpu.memory_space<vmem>>, vector<16x16xf32>
    %c16 = arith.constant 16 : index
    %c0_31 = arith.constant 0 : index
    %74 = vector.load %arg2[%c16, %c0_31] : memref<56x128xf32, #tpu.memory_space<vmem>>, vector<16x16xf32>
    %75 = vector.extract_strided_slice %60 {offsets = [0, 0], sizes = [16, 32], strides = [1, 1]} : vector<32x32xf32> to vector<16x32xf32>
    %76 = vector.extract_strided_slice %65 {offsets = [0, 0], sizes = [16, 32], strides = [1, 1]} : vector<32x32xf32> to vector<16x32xf32>
    %77 = arith.truncf %76 : vector<16x32xf32> to vector<16x32xbf16>
    %78 = vector.broadcast %71 : vector<1x32xf32> to vector<16x32xf32>
    %79 = arith.mulf %75, %78 : vector<16x32xf32>
    %80 = arith.truncf %79 : vector<16x32xf32> to vector<16x32xbf16>
    %cst_32 = arith.constant dense<0.000000e+00> : vector<16x16xf32>
    %81 = tpu.matmul %80, %77, %cst_32 {dimension_numbers = #tpu.dot_dimension_numbers<[1], [1], [0], [0], [0, 0, 1, 0], [], []>} : vector<16x32xbf16>, vector<16x32xbf16>, vector<16x16xf32> -> vector<16x16xf32>
    %82 = arith.addf %81, %73 : vector<16x16xf32>
    %83 = vector.broadcast %72 : vector<1x32xf32> to vector<16x32xf32>
    %84 = arith.mulf %75, %83 : vector<16x32xf32>
    %85 = arith.truncf %84 : vector<16x32xf32> to vector<16x32xbf16>
    %cst_33 = arith.constant dense<0.000000e+00> : vector<16x16xf32>
    %86 = tpu.matmul %85, %77, %cst_33 {dimension_numbers = #tpu.dot_dimension_numbers<[1], [1], [0], [0], [0, 0, 1, 0], [], []>} : vector<16x32xbf16>, vector<16x32xbf16>, vector<16x16xf32> -> vector<16x16xf32>
    %87 = arith.addf %86, %74 : vector<16x16xf32>
    %88 = vector.extract_strided_slice %60 {offsets = [16, 0], sizes = [16, 32], strides = [1, 1]} : vector<32x32xf32> to vector<16x32xf32>
    %89 = vector.extract_strided_slice %65 {offsets = [16, 0], sizes = [16, 32], strides = [1, 1]} : vector<32x32xf32> to vector<16x32xf32>
    %90 = arith.truncf %89 : vector<16x32xf32> to vector<16x32xbf16>
    %91 = vector.broadcast %71 : vector<1x32xf32> to vector<16x32xf32>
    %92 = arith.mulf %88, %91 : vector<16x32xf32>
    %93 = arith.truncf %92 : vector<16x32xf32> to vector<16x32xbf16>
    %cst_34 = arith.constant dense<0.000000e+00> : vector<16x16xf32>
    %94 = tpu.matmul %93, %90, %cst_34 {dimension_numbers = #tpu.dot_dimension_numbers<[1], [1], [0], [0], [0, 0, 1, 0], [], []>} : vector<16x32xbf16>, vector<16x32xbf16>, vector<16x16xf32> -> vector<16x16xf32>
    %95 = arith.addf %94, %73 : vector<16x16xf32>
    %96 = vector.broadcast %72 : vector<1x32xf32> to vector<16x32xf32>
    %97 = arith.mulf %88, %96 : vector<16x32xf32>
    %98 = arith.truncf %97 : vector<16x32xf32> to vector<16x32xbf16>
    %cst_35 = arith.constant dense<0.000000e+00> : vector<16x16xf32>
    %99 = tpu.matmul %98, %90, %cst_35 {dimension_numbers = #tpu.dot_dimension_numbers<[1], [1], [0], [0], [0, 0, 1, 0], [], []>} : vector<16x32xbf16>, vector<16x32xbf16>, vector<16x16xf32> -> vector<16x16xf32>
    %100 = arith.addf %99, %74 : vector<16x16xf32>
    %101 = tpu.concatenate %82, %87, %95, %100 in 0 : vector<16x16xf32>, vector<16x16xf32>, vector<16x16xf32>, vector<16x16xf32> -> vector<64x16xf32>
    %cst_36 = arith.constant dense<0xFF800000> : vector<64xf32>
    %102 = vector.multi_reduction <maximumf>, %101, %cst_36 [1] : vector<64x16xf32> to vector<64xf32>
    %103 = vector.shape_cast %102 : vector<64xf32> to vector<64x1xf32>
    %104 = vector.broadcast %103 : vector<64x1xf32> to vector<64x16xf32>
    %105 = arith.subf %101, %104 : vector<64x16xf32>
    %106 = math.exp %105 : vector<64x16xf32>
    %cst_37 = arith.constant dense<0.000000e+00> : vector<64xf32>
    %107 = vector.multi_reduction <add>, %106, %cst_37 [1] : vector<64x16xf32> to vector<64xf32>
    %108 = vector.shape_cast %107 : vector<64xf32> to vector<64x1xf32>
    %109 = vector.broadcast %108 : vector<64x1xf32> to vector<64x16xf32>
    %110 = arith.divf %106, %109 : vector<64x16xf32>
    %111 = vector.extract_strided_slice %70 {offsets = [0, 0], sizes = [16, 32], strides = [1, 1]} : vector<32x32xf32> to vector<16x32xf32>
    %cst_38 = arith.constant 0.000000e+00 : f32
    %112 = vector.broadcast %cst_38 : f32 to vector<16x32xf32>
    %113 = vector.extract_strided_slice %110 {offsets = [0, 0], sizes = [16, 16], strides = [1, 1]} : vector<64x16xf32> to vector<16x16xf32>
    %114 = arith.truncf %113 : vector<16x16xf32> to vector<16x16xbf16>
    %115 = vector.broadcast %71 : vector<1x32xf32> to vector<16x32xf32>
    %116 = arith.mulf %111, %115 : vector<16x32xf32>
    %117 = arith.truncf %116 : vector<16x32xf32> to vector<16x32xbf16>
    %cst_39 = arith.constant dense<0.000000e+00> : vector<16x32xf32>
    %118 = tpu.matmul %114, %117, %cst_39 {dimension_numbers = #tpu.dot_dimension_numbers<[1], [0], [0], [1], [0, 0, 1, 1], [], []>} : vector<16x16xbf16>, vector<16x32xbf16>, vector<16x32xf32> -> vector<16x32xf32>
    %119 = arith.addf %112, %118 : vector<16x32xf32>
    %120 = vector.extract_strided_slice %110 {offsets = [16, 0], sizes = [16, 16], strides = [1, 1]} : vector<64x16xf32> to vector<16x16xf32>
    %121 = arith.truncf %120 : vector<16x16xf32> to vector<16x16xbf16>
    %122 = vector.broadcast %72 : vector<1x32xf32> to vector<16x32xf32>
    %123 = arith.mulf %111, %122 : vector<16x32xf32>
    %124 = arith.truncf %123 : vector<16x32xf32> to vector<16x32xbf16>
    %cst_40 = arith.constant dense<0.000000e+00> : vector<16x32xf32>
    %125 = tpu.matmul %121, %124, %cst_40 {dimension_numbers = #tpu.dot_dimension_numbers<[1], [0], [0], [1], [0, 0, 1, 1], [], []>} : vector<16x16xbf16>, vector<16x32xbf16>, vector<16x32xf32> -> vector<16x32xf32>
    %126 = arith.addf %119, %125 : vector<16x32xf32>
    %127 = vector.extract_strided_slice %70 {offsets = [16, 0], sizes = [16, 32], strides = [1, 1]} : vector<32x32xf32> to vector<16x32xf32>
    %cst_41 = arith.constant 0.000000e+00 : f32
    %128 = vector.broadcast %cst_41 : f32 to vector<16x32xf32>
    %129 = vector.extract_strided_slice %110 {offsets = [32, 0], sizes = [16, 16], strides = [1, 1]} : vector<64x16xf32> to vector<16x16xf32>
    %130 = arith.truncf %129 : vector<16x16xf32> to vector<16x16xbf16>
    %131 = vector.broadcast %71 : vector<1x32xf32> to vector<16x32xf32>
    %132 = arith.mulf %127, %131 : vector<16x32xf32>
    %133 = arith.truncf %132 : vector<16x32xf32> to vector<16x32xbf16>
    %cst_42 = arith.constant dense<0.000000e+00> : vector<16x32xf32>
    %134 = tpu.matmul %130, %133, %cst_42 {dimension_numbers = #tpu.dot_dimension_numbers<[1], [0], [0], [1], [0, 0, 1, 1], [], []>} : vector<16x16xbf16>, vector<16x32xbf16>, vector<16x32xf32> -> vector<16x32xf32>
    %135 = arith.addf %128, %134 : vector<16x32xf32>
    %136 = vector.extract_strided_slice %110 {offsets = [48, 0], sizes = [16, 16], strides = [1, 1]} : vector<64x16xf32> to vector<16x16xf32>
    %137 = arith.truncf %136 : vector<16x16xf32> to vector<16x16xbf16>
    %138 = vector.broadcast %72 : vector<1x32xf32> to vector<16x32xf32>
    %139 = arith.mulf %127, %138 : vector<16x32xf32>
    %140 = arith.truncf %139 : vector<16x32xf32> to vector<16x32xbf16>
    %cst_43 = arith.constant dense<0.000000e+00> : vector<16x32xf32>
    %141 = tpu.matmul %137, %140, %cst_43 {dimension_numbers = #tpu.dot_dimension_numbers<[1], [0], [0], [1], [0, 0, 1, 1], [], []>} : vector<16x16xbf16>, vector<16x32xbf16>, vector<16x32xf32> -> vector<16x32xf32>
    %142 = arith.addf %135, %141 : vector<16x32xf32>
    %143 = tpu.concatenate %126, %142 in 0 : vector<16x32xf32>, vector<16x32xf32> -> vector<32x32xf32>
    %144 = arith.truncf %143 : vector<32x32xf32> to vector<32x32xbf16>
    %c144 = arith.constant 144 : index
    %c0_44 = arith.constant 0 : index
    %145 = vector.load %arg1[%c144, %c0_44] : memref<368x128xbf16, #tpu.memory_space<vmem>>, vector<32x32xbf16>
    %cst_45 = arith.constant dense<0.000000e+00> : vector<32x32xf32>
    %146 = tpu.matmul %144, %145, %cst_45 {dimension_numbers = #tpu.dot_dimension_numbers<[1], [0], [0], [1], [0, 0, 1, 1], [], []>} : vector<32x32xbf16>, vector<32x32xbf16>, vector<32x32xf32> -> vector<32x32xf32>
    %c42 = arith.constant 42 : index
    %c0_46 = arith.constant 0 : index
    %147 = vector.load %arg2[%c42, %c0_46] : memref<56x128xf32, #tpu.memory_space<vmem>>, vector<1x32xf32>
    %148 = vector.broadcast %147 : vector<1x32xf32> to vector<32x32xf32>
    %149 = arith.addf %146, %148 : vector<32x32xf32>
    %150 = arith.addf %30, %149 : vector<32x32xf32>
    %c43 = arith.constant 43 : index
    %c0_47 = arith.constant 0 : index
    %151 = vector.load %arg2[%c43, %c0_47] : memref<56x128xf32, #tpu.memory_space<vmem>>, vector<1x32xf32>
    %c44 = arith.constant 44 : index
    %c0_48 = arith.constant 0 : index
    %152 = vector.load %arg2[%c44, %c0_48] : memref<56x128xf32, #tpu.memory_space<vmem>>, vector<1x32xf32>
    %cst_49 = arith.constant dense<0.000000e+00> : vector<32xf32>
    %153 = vector.multi_reduction <add>, %150, %cst_49 [1] : vector<32x32xf32> to vector<32xf32>
    %154 = vector.shape_cast %153 : vector<32xf32> to vector<32x1xf32>
    %cst_50 = arith.constant 3.200000e+01 : f32
    %155 = vector.broadcast %cst_50 : f32 to vector<32x1xf32>
    %156 = arith.divf %154, %155 : vector<32x1xf32>
    %157 = vector.broadcast %156 : vector<32x1xf32> to vector<32x32xf32>
    %158 = arith.subf %150, %157 : vector<32x32xf32>
    %159 = arith.mulf %158, %158 : vector<32x32xf32>
    %cst_51 = arith.constant dense<0.000000e+00> : vector<32xf32>
    %160 = vector.multi_reduction <add>, %159, %cst_51 [1] : vector<32x32xf32> to vector<32xf32>
    %161 = vector.shape_cast %160 : vector<32xf32> to vector<32x1xf32>
    %cst_52 = arith.constant 3.200000e+01 : f32
    %162 = vector.broadcast %cst_52 : f32 to vector<32x1xf32>
    %163 = arith.divf %161, %162 : vector<32x1xf32>
    %164 = vector.broadcast %156 : vector<32x1xf32> to vector<32x32xf32>
    %165 = arith.subf %150, %164 : vector<32x32xf32>
    %cst_53 = arith.constant 9.99999974E-6 : f32
    %166 = vector.broadcast %cst_53 : f32 to vector<32x1xf32>
    %167 = arith.addf %163, %166 : vector<32x1xf32>
    %168 = math.rsqrt %167 : vector<32x1xf32>
    %169 = vector.broadcast %168 : vector<32x1xf32> to vector<32x32xf32>
    %170 = arith.mulf %165, %169 : vector<32x32xf32>
    %171 = vector.broadcast %151 : vector<1x32xf32> to vector<32x32xf32>
    %172 = arith.mulf %170, %171 : vector<32x32xf32>
    %173 = vector.broadcast %152 : vector<1x32xf32> to vector<32x32xf32>
    %174 = arith.addf %172, %173 : vector<32x32xf32>
    %175 = arith.truncf %174 : vector<32x32xf32> to vector<32x32xbf16>
    %c176 = arith.constant 176 : index
    %c0_54 = arith.constant 0 : index
    %176 = vector.load %arg1[%c176, %c0_54] : memref<368x128xbf16, #tpu.memory_space<vmem>>, vector<32x128xbf16>
    %cst_55 = arith.constant dense<0.000000e+00> : vector<32x128xf32>
    %177 = tpu.matmul %175, %176, %cst_55 {dimension_numbers = #tpu.dot_dimension_numbers<[1], [0], [0], [1], [0, 0, 1, 1], [], []>} : vector<32x32xbf16>, vector<32x128xbf16>, vector<32x128xf32> -> vector<32x128xf32>
    %c45 = arith.constant 45 : index
    %c0_56 = arith.constant 0 : index
    %178 = vector.load %arg2[%c45, %c0_56] : memref<56x128xf32, #tpu.memory_space<vmem>>, vector<1x128xf32>
    %179 = vector.broadcast %178 : vector<1x128xf32> to vector<32x128xf32>
    %180 = arith.addf %177, %179 : vector<32x128xf32>
    %cst_57 = arith.constant 5.000000e-01 : f32
    %181 = vector.broadcast %cst_57 : f32 to vector<32x128xf32>
    %182 = arith.mulf %181, %180 : vector<32x128xf32>
    %cst_58 = arith.constant 0.707106769 : f32
    %183 = vector.broadcast %cst_58 : f32 to vector<32x128xf32>
    %184 = arith.mulf %180, %183 : vector<32x128xf32>
    %cst_59 = arith.constant 0.000000e+00 : f32
    %185 = vector.broadcast %cst_59 : f32 to vector<32x128xf32>
    %186 = arith.cmpf oge, %184, %185 : vector<32x128xf32>
    %cst_60 = arith.constant 1.000000e+00 : f32
    %cst_61 = arith.constant -1.000000e+00 : f32
    %187 = vector.broadcast %cst_60 : f32 to vector<32x128xf32>
    %188 = vector.broadcast %cst_61 : f32 to vector<32x128xf32>
    %189 = arith.select %186, %187, %188 : vector<32x128xi1>, vector<32x128xf32>
    %190 = math.absf %184 : vector<32x128xf32>
    %cst_62 = arith.constant 0.327591091 : f32
    %191 = vector.broadcast %cst_62 : f32 to vector<32x128xf32>
    %192 = arith.mulf %191, %190 : vector<32x128xf32>
    %cst_63 = arith.constant 1.000000e+00 : f32
    %193 = vector.broadcast %cst_63 : f32 to vector<32x128xf32>
    %194 = arith.addf %193, %192 : vector<32x128xf32>
    %cst_64 = arith.constant 1.000000e+00 : f32
    %195 = vector.broadcast %cst_64 : f32 to vector<32x128xf32>
    %196 = arith.divf %195, %194 : vector<32x128xf32>
    %cst_65 = arith.constant 1.06140542 : f32
    %197 = vector.broadcast %cst_65 : f32 to vector<32x128xf32>
    %198 = arith.mulf %197, %196 : vector<32x128xf32>
    %cst_66 = arith.constant -1.45315206 : f32
    %199 = vector.broadcast %cst_66 : f32 to vector<32x128xf32>
    %200 = arith.addf %198, %199 : vector<32x128xf32>
    %201 = arith.mulf %200, %196 : vector<32x128xf32>
    %cst_67 = arith.constant 1.42141378 : f32
    %202 = vector.broadcast %cst_67 : f32 to vector<32x128xf32>
    %203 = arith.addf %201, %202 : vector<32x128xf32>
    %204 = arith.mulf %203, %196 : vector<32x128xf32>
    %cst_68 = arith.constant -0.284496725 : f32
    %205 = vector.broadcast %cst_68 : f32 to vector<32x128xf32>
    %206 = arith.addf %204, %205 : vector<32x128xf32>
    %207 = arith.mulf %206, %196 : vector<32x128xf32>
    %cst_69 = arith.constant 0.254829586 : f32
    %208 = vector.broadcast %cst_69 : f32 to vector<32x128xf32>
    %209 = arith.addf %207, %208 : vector<32x128xf32>
    %210 = arith.mulf %209, %196 : vector<32x128xf32>
    %cst_70 = arith.constant 0.000000e+00 : f32
    %211 = vector.broadcast %cst_70 : f32 to vector<32x128xf32>
    %212 = arith.subf %211, %190 : vector<32x128xf32>
    %213 = arith.mulf %212, %190 : vector<32x128xf32>
    %214 = math.exp %213 : vector<32x128xf32>
    %215 = arith.mulf %210, %214 : vector<32x128xf32>
    %cst_71 = arith.constant 1.000000e+00 : f32
    %216 = vector.broadcast %cst_71 : f32 to vector<32x128xf32>
    %217 = arith.subf %216, %215 : vector<32x128xf32>
    %218 = arith.mulf %189, %217 : vector<32x128xf32>
    %cst_72 = arith.constant 1.000000e+00 : f32
    %219 = vector.broadcast %cst_72 : f32 to vector<32x128xf32>
    %220 = arith.addf %219, %218 : vector<32x128xf32>
    %221 = arith.mulf %182, %220 : vector<32x128xf32>
    %222 = arith.truncf %221 : vector<32x128xf32> to vector<32x128xbf16>
    %c208 = arith.constant 208 : index
    %c0_73 = arith.constant 0 : index
    %223 = vector.load %arg1[%c208, %c0_73] : memref<368x128xbf16, #tpu.memory_space<vmem>>, vector<128x32xbf16>
    %cst_74 = arith.constant dense<0.000000e+00> : vector<32x32xf32>
    %224 = tpu.matmul %222, %223, %cst_74 {dimension_numbers = #tpu.dot_dimension_numbers<[1], [0], [0], [1], [0, 0, 1, 1], [], []>} : vector<32x128xbf16>, vector<128x32xbf16>, vector<32x32xf32> -> vector<32x32xf32>
    %c46 = arith.constant 46 : index
    %c0_75 = arith.constant 0 : index
    %225 = vector.load %arg2[%c46, %c0_75] : memref<56x128xf32, #tpu.memory_space<vmem>>, vector<1x32xf32>
    %226 = vector.broadcast %225 : vector<1x32xf32> to vector<32x32xf32>
    %227 = arith.addf %224, %226 : vector<32x32xf32>
    %228 = arith.addf %150, %227 : vector<32x32xf32>
    %c47 = arith.constant 47 : index
    %c0_76 = arith.constant 0 : index
    %229 = vector.load %arg2[%c47, %c0_76] : memref<56x128xf32, #tpu.memory_space<vmem>>, vector<1x32xf32>
    %c48_77 = arith.constant 48 : index
    %c0_78 = arith.constant 0 : index
    %230 = vector.load %arg2[%c48_77, %c0_78] : memref<56x128xf32, #tpu.memory_space<vmem>>, vector<1x32xf32>
    %cst_79 = arith.constant dense<0.000000e+00> : vector<32xf32>
    %231 = vector.multi_reduction <add>, %228, %cst_79 [1] : vector<32x32xf32> to vector<32xf32>
    %232 = vector.shape_cast %231 : vector<32xf32> to vector<32x1xf32>
    %cst_80 = arith.constant 3.200000e+01 : f32
    %233 = vector.broadcast %cst_80 : f32 to vector<32x1xf32>
    %234 = arith.divf %232, %233 : vector<32x1xf32>
    %235 = vector.broadcast %234 : vector<32x1xf32> to vector<32x32xf32>
    %236 = arith.subf %228, %235 : vector<32x32xf32>
    %237 = arith.mulf %236, %236 : vector<32x32xf32>
    %cst_81 = arith.constant dense<0.000000e+00> : vector<32xf32>
    %238 = vector.multi_reduction <add>, %237, %cst_81 [1] : vector<32x32xf32> to vector<32xf32>
    %239 = vector.shape_cast %238 : vector<32xf32> to vector<32x1xf32>
    %cst_82 = arith.constant 3.200000e+01 : f32
    %240 = vector.broadcast %cst_82 : f32 to vector<32x1xf32>
    %241 = arith.divf %239, %240 : vector<32x1xf32>
    %242 = vector.broadcast %234 : vector<32x1xf32> to vector<32x32xf32>
    %243 = arith.subf %228, %242 : vector<32x32xf32>
    %cst_83 = arith.constant 9.99999974E-6 : f32
    %244 = vector.broadcast %cst_83 : f32 to vector<32x1xf32>
    %245 = arith.addf %241, %244 : vector<32x1xf32>
    %246 = math.rsqrt %245 : vector<32x1xf32>
    %247 = vector.broadcast %246 : vector<32x1xf32> to vector<32x32xf32>
    %248 = arith.mulf %243, %247 : vector<32x32xf32>
    %249 = vector.broadcast %229 : vector<1x32xf32> to vector<32x32xf32>
    %250 = arith.mulf %248, %249 : vector<32x32xf32>
    %251 = vector.broadcast %230 : vector<1x32xf32> to vector<32x32xf32>
    %252 = arith.addf %250, %251 : vector<32x32xf32>
    %253 = tpu.iota {dimensions = array<i32: 0>} : vector<8x32xi32>
    %254 = tpu.iota {dimensions = array<i32: 1>} : vector<8x32xi32>
    %c16_i32 = arith.constant 16 : i32
    %255 = vector.broadcast %c16_i32 : i32 to vector<8x32xi32>
    %256 = arith.muli %253, %255 : vector<8x32xi32>
    %257 = arith.cmpi sge, %254, %256 : vector<8x32xi32>
    %c16_i32_84 = arith.constant 16 : i32
    %258 = vector.broadcast %c16_i32_84 : i32 to vector<8x32xi32>
    %259 = arith.addi %256, %258 : vector<8x32xi32>
    %260 = arith.cmpi slt, %254, %259 : vector<8x32xi32>
    %261 = arith.andi %257, %260 : vector<8x32xi1>
    %cst_85 = arith.constant 6.250000e-02 : f32
    %cst_86 = arith.constant 0.000000e+00 : f32
    %262 = vector.broadcast %cst_85 : f32 to vector<8x32xf32>
    %263 = vector.broadcast %cst_86 : f32 to vector<8x32xf32>
    %264 = arith.select %261, %262, %263 : vector<8x32xi1>, vector<8x32xf32>
    %cst_87 = arith.constant dense<0.000000e+00> : vector<8x32xf32>
    %265 = tpu.matmul %264, %252, %cst_87 {dimension_numbers = #tpu.dot_dimension_numbers<[1], [0], [0], [1], [0, 0, 1, 1], [], []>} : vector<8x32xf32>, vector<32x32xf32>, vector<8x32xf32> -> vector<8x32xf32>
    %266 = arith.truncf %265 : vector<8x32xf32> to vector<8x32xbf16>
    %c336 = arith.constant 336 : index
    %c0_88 = arith.constant 0 : index
    %267 = vector.load %arg1[%c336, %c0_88] : memref<368x128xbf16, #tpu.memory_space<vmem>>, vector<32x128xbf16>
    %cst_89 = arith.constant dense<0.000000e+00> : vector<8x128xf32>
    %268 = tpu.matmul %266, %267, %cst_89 {dimension_numbers = #tpu.dot_dimension_numbers<[1], [0], [0], [1], [0, 0, 1, 1], [], []>} : vector<8x32xbf16>, vector<32x128xbf16>, vector<8x128xf32> -> vector<8x128xf32>
    %c49 = arith.constant 49 : index
    %c0_90 = arith.constant 0 : index
    %269 = vector.load %arg2[%c49, %c0_90] : memref<56x128xf32, #tpu.memory_space<vmem>>, vector<1x128xf32>
    %270 = vector.broadcast %269 : vector<1x128xf32> to vector<8x128xf32>
    %271 = arith.addf %268, %270 : vector<8x128xf32>
    %c0_91 = arith.constant 0 : index
    %c0_92 = arith.constant 0 : index
    %272 = vector.load %arg3[%c0_91, %c0_92] : memref<8x128xf32, #tpu.memory_space<vmem>>, vector<8x128xf32>
    tpu.vector_store %arg3[%c0_91, %c0_92], %271 {strides = array<i32>} : memref<8x128xf32, #tpu.memory_space<vmem>>, vector<8x128xf32>,
    return
  }
}

</mosaic_0001>

<bundles_post_ra>
// kernel: swin_transformer_self_forward.1
= control target key start
LH: loop header
LB: loop body
LE: loop exit
PB: predicated region body
PF: predicated region fallthrough
CT: control target
= control target key end

     0   :  { %vm50_vm0 = vcmask 392192   ;;  %vm108_vm1 = vcmask 261120   ;;  %vm2023_vm2 = vmmov 0   ;;  %vm676_vm3 = vcmask 130048   ;;  %s2387_s1 = inlined_call_operand.vmem [shape: bf16[368,128], index: 1, kind: input, shape index: {}]   ;;  %s2388_s0 = inlined_call_operand.vmem [shape: f32[32,48], index: 0, kind: input, shape index: {}]   ;;  %s2389_s2 = inlined_call_operand.vmem [shape: f32[56,128], index: 2, kind: input, shape index: {}]   ;;  %s2390_s3 = inlined_call_operand.vmem [shape: f32[8,128], index: 3, kind: output, shape index: {}]  }
   0x1   :  { %v1919_v0 = vld [vmem:[%s2387_s1] sm:$0xff]   ;;  %v1920_v1 = vld [vmem:[%s2387_s1 + $0x8] sm:$0xff]   ;;  %v1921_v4 = vld [vmem:[%s2387_s1 + $0x10] sm:$0xff]  }
   0x2   :  { %1764 = vmatprep.subr.bf16.mxu0 %v1919_v0  ;;  %v15_v2 = vld [vmem:[%s2388_s0] sm:$0xff]  ;;  %v16_v3 = vld [vmem:[%s2388_s0 + $0x8] sm:$0xff]  ;;  %v17_v6 = vld [vmem:[%s2388_s0 + $0x10] sm:$0xff] }
   0x3   :  { %1765 = vmatpush3.bf16.msra.mxu0 %v1919_v0  ;;  %v19_v5 = vpack.c.bf16 %v16_v3, %v15_v2  ;;  %v18_v7 = vld [vmem:[%s2388_s0 + $0x18] sm:$0xff]  ;;  %v1642_v9 = vld [vmem:[%s2389_s2 + $0x22] ss:$0 sm:$0xff]  ;;  %v1648_v55 = vld [vmem:[%s2389_s2 + $0x23] ss:$0 sm:$0xff] }
   0x4   :  { %1766 = vmatprep.subr.bf16.mxu0 %v1920_v1  ;;  %v20_v8 = vpack.c.bf16 %v18_v7, %v17_v6  ;;  %v1649_v57 = vld [vmem:[%s2389_s2 + $0x24] ss:$0 sm:$0xff] }
   0x5   :  { %1770 = vmatprep.mubr.msk.bf16.mxu0 %vm50_vm0, %v19_v5 }
   0x7   :  { %1767 = vmatpush3.bf16.msra.mxu0 %v1920_v1 }
   0x8   :  { %1768 = vmatprep.subr.bf16.mxu0 %v1921_v4 }
   0xb   :  { %1769 = vmatpush3.bf16.msra.mxu0 %v1921_v4 }
   0xe   :  { %1771 = vmatmul.mubr.msk.bf16.vlgmr.msra.gmra.mrb[0].mxu0 %vm50_vm0, %v20_v8 }
  0xe1   :  { %v1772_v10 = vpop.f32.mrb[0].mxu0 }
  0xe2   :  { %v100_v11 = vadd.f32 %v1772_v10, %v1642_v9  ;;  %v91_v12 = vpop.f32.mrb[1].mxu0 }
  0xe3   :  { %v92_v13 = vadd.f32 %v1642_v9, %v91_v12  ;;  %v1773_v14 = vpop.f32.mrb[2].mxu0 }
  0xe4   :  { %v103_v15 = vadd.f32 %v1773_v14, %v1642_v9  ;;  %v94_v16 = vpop.f32.mrb[3].mxu0  ;;  %v115_v17 = vsel %vm108_vm1, %v100_v11, 0.0 }
  0xe5   :  { %v95_v18 = vadd.f32 %v1642_v9, %v94_v16  ;;  %116 = vadd.xlane.f32.xlu1 %v115_v17  ;;  %v109_v19 = vsel %vm108_vm1, %v92_v13, 0.0 }
  0xe6   :  { %110 = vadd.xlane.f32.xlu0 %v109_v19  ;;  %v118_v20 = vsel %vm108_vm1, %v103_v15, 0.0 }
  0xe7   :  { %v112_v21 = vsel %vm108_vm1, %v95_v18, 0.0 }
  0xe9   :  { %119 = vadd.xlane.f32.xlu1 %v118_v20 }
  0xea   :  { %113 = vadd.xlane.f32.xlu0 %v112_v21 }
 0x172   :  { %v117_v22 = vpop.xlane.xlu1 %116 }
 0x173   :  { %v124_v23 = vmul.f32 0.03125, %v117_v22  ;;  %v111_v24 = vpop.xlane.xlu0 %110 }
 0x174   :  { %v122_v25 = vmul.f32 0.03125, %v111_v24 }
 0x175   :  { %v128_v26 = vsub.f32 %v100_v11, %v124_v23 }
 0x176   :  { %v126_v27 = vsub.f32 %v92_v13, %v122_v25  ;;  %v120_v28 = vpop.xlane.xlu1 %119 }
 0x177   :  { %v125_v29 = vmul.f32 0.03125, %v120_v28  ;;  %v114_v30 = vpop.xlane.xlu0 %113  ;;  %v132_v36 = vmul.f32 %v128_v26, %v128_v26 }
 0x178   :  { %v123_v31 = vmul.f32 0.03125, %v114_v30  ;;  %v130_v32 = vmul.f32 %v126_v27, %v126_v27 }
 0x179   :  { %v129_v33 = vsub.f32 %v103_v15, %v125_v29  ;;  %v140_v38 = vsel %vm108_vm1, %v132_v36, 0.0  ;;  %v1926_v36 = vld [vmem:[%s2387_s1 + $0x38] sm:$0xff]  }
 0x17a   :  { %v127_v34 = vsub.f32 %v95_v18, %v123_v31  ;;  %v134_v35 = vsel %vm108_vm1, %v130_v32, 0.0  ;;  %v1922_v32 = vld [vmem:[%s2387_s1 + $0x18] sm:$0xff]  }
 0x17b   :  { %135 = vadd.xlane.f32.xlu0 %v134_v35  ;;  %v133_v40 = vmul.f32 %v129_v33, %v129_v33  ;;  %1774 = vmatprep.subr.bf16.mxu0 %v1922_v32  ;;  %v1925_v35 = vld [vmem:[%s2387_s1 + $0x30] sm:$0xff]  }
 0x17c   :  { %v131_v37 = vmul.f32 %v127_v34, %v127_v34  ;;  %1775 = vmatpush3.bf16.msra.mxu0 %v1922_v32 }
 0x17d   :  { %v143_v41 = vsel %vm108_vm1, %v133_v40, 0.0 }
 0x17e   :  { %v137_v39 = vsel %vm108_vm1, %v131_v37, 0.0 }
 0x17f   :  { %141 = vadd.xlane.f32.xlu0 %v140_v38  ;;  %138 = vadd.xlane.f32.xlu1 %v137_v39 }
 0x183   :  { %144 = vadd.xlane.f32.xlu1 %v143_v41 }
 0x208   :  { %v136_v42 = vpop.xlane.xlu0 %135 }
 0x209   :  { %v146_v43 = vmul.f32 0.03125, %v136_v42 }
 0x20b   :  { %v150_v44 = vadd.f32 1e-05, %v146_v43 }
 0x20c   :  { %v139_v45 = vpop.xlane.xlu1 %138  ;;  %v142_v46 = vpop.xlane.xlu0 %141 }
 0x20d   :  { %1942 = vrsqrt.f32 %v150_v44  ;;  %v147_v47 = vmul.f32 0.03125, %v139_v45  ;;  %v148_v48 = vmul.f32 0.03125, %v142_v46 }
 0x20f   :  { %v151_v49 = vadd.f32 1e-05, %v147_v47  ;;  %v152_v50 = vadd.f32 1e-05, %v148_v48 }
 0x210   :  { %v145_v51 = vpop.xlane.xlu1 %144 }
 0x211   :  { %1944 = vrsqrt.f32 %v151_v49  ;;  %v149_v52 = vmul.f32 0.03125, %v145_v51  ;;  %v1650_v51 = vld [vmem:[%s2389_s2 + $0x25] ss:$0 sm:$0xff] }
 0x212   :  { %1946 = vrsqrt.f32 %v152_v50 }
 0x213   :  { %v153_v53 = vadd.f32 1e-05, %v149_v52 }
 0x215   :  { %1948 = vrsqrt.f32 %v153_v53 }
 0x217   :  { %v1943_v54 = vpop.eup %1942 }
 0x218   :  { %v158_v56 = vmul.f32 %v1943_v54, %v126_v27 }
 0x21a   :  { %v166_v58 = vmul.f32 %v1648_v55, %v158_v56 }
 0x21b   :  { %v1945_v59 = vpop.eup %1944 }
 0x21c   :  { %v1947_v60 = vpop.eup %1946  ;;  %v2084_v61 = vadd.f32 %v1649_v57, %v166_v58  ;;  %v159_v62 = vmul.f32 %v1945_v59, %v127_v34  ;;  %v1924_v34 = vld [vmem:[%s2387_s1 + $0x20] sm:$0xff]  }
 0x21d   :  { %v160_v63 = vmul.f32 %v1947_v60, %v128_v26  ;;  %1776 = vmatprep.subr.bf16.mxu0 %v1924_v34 }
 0x21e   :  { %v180_v0 = vsel %vm108_vm1, %v2084_v61, 0.0  ;;  %v167_v1 = vmul.f32 %v1648_v55, %v159_v62  ;;  %1777 = vmatpush3.bf16.msra.mxu0 %v1924_v34 }
 0x21f   :  { %v1949_v2 = vpop.eup %1948  ;;  %181 = vadd.xlane.f32.xlu0 %v180_v0  ;;  %v168_v3 = vmul.f32 %v1648_v55, %v160_v63  ;;  %1790 = vmatprep.subr.bf16.mxu0 %v1926_v36 }
 0x220   :  { %v2088_v4 = vadd.f32 %v1649_v57, %v167_v1  ;;  %v161_v5 = vmul.f32 %v1949_v2, %v129_v33  ;;  %v1923_v33 = vld [vmem:[%s2387_s1 + $0x28] sm:$0xff]  }
 0x221   :  { %v2090_v6 = vadd.f32 %v1649_v57, %v168_v3  ;;  %1782 = vmatprep.subr.bf16.mxu1 %v1923_v33 }
 0x222   :  { %v183_v7 = vsel %vm108_vm1, %v2088_v4, 0.0  ;;  %v169_v8 = vmul.f32 %v1648_v55, %v161_v5  ;;  %1783 = vmatpush3.bf16.msra.mxu1 %v1923_v33 }
 0x223   :  { %184 = vadd.xlane.f32.xlu1 %v183_v7  ;;  %v186_v9 = vsel %vm108_vm1, %v2090_v6, 0.0  ;;  %1784 = vmatprep.subr.bf16.mxu1 %v1925_v35 }
 0x224   :  { %187 = vadd.xlane.f32.xlu0 %v186_v9  ;;  %v2096_v10 = vadd.f32 %v1649_v57, %v169_v8  ;;  %v1651_v57 = vld [vmem:[%s2389_s2 + $0x26] ss:$0 sm:$0xff]  ;;  %v2022_v9 = vmov 0.0  }
 0x225   :  { %v1927_v8 = vld [vmem:[%s2387_s1 + $0x40] sm:$0xff]  }
 0x226   :  { %v189_v11 = vsel %vm108_vm1, %v2096_v10, 0.0  ;;  %1785 = vmatpush3.bf16.msra.mxu1 %v1925_v35 }
 0x227   :  { %190 = vadd.xlane.f32.xlu1 %v189_v11  ;;  %1798 = vmatprep.subr.bf16.mxu1 %v2022_v9  ;;  %v1652_v11 = vld [vmem:[%s2389_s2 + $0x27] ss:$0 sm:$0xff] }
 0x2ac   :  { %v182_v12 = vpop.xlane.xlu0 %181 }
 0x2ad   :  { %v192_v13 = vmul.f32 0.03125, %v182_v12 }
 0x2af   :  { %v196_v14 = vsub.f32 %v2084_v61, %v192_v13 }
 0x2b0   :  { %v185_v15 = vpop.xlane.xlu1 %184 }
 0x2b1   :  { %v193_v16 = vmul.f32 0.03125, %v185_v15  ;;  %v188_v17 = vpop.xlane.xlu0 %187  ;;  %v200_v18 = vmul.f32 %v196_v14, %v196_v14 }
 0x2b2   :  { %v194_v19 = vmul.f32 0.03125, %v188_v17  ;;  %v1669_v17 = vld [vmem:[%s2389_s2 + $0x21] ss:$0 sm:$0xff] }
 0x2b3   :  { %v197_v20 = vsub.f32 %v2088_v4, %v193_v16  ;;  %v204_v21 = vsel %vm108_vm1, %v200_v18, 0.0  ;;  %v1667_v16 = vld [vmem:[%s2389_s2 + $0x20] ss:$0 sm:$0xff] }
 0x2b4   :  { %v198_v22 = vsub.f32 %v2090_v6, %v194_v19  ;;  %v191_v23 = vpop.xlane.xlu1 %190  ;;  %205 = vadd.xlane.f32.xlu0 %v204_v21 }
 0x2b5   :  { %v195_v24 = vmul.f32 0.03125, %v191_v23  ;;  %v201_v25 = vmul.f32 %v197_v20, %v197_v20 }
 0x2b6   :  { %v202_v26 = vmul.f32 %v198_v22, %v198_v22 }
 0x2b7   :  { %v199_v27 = vsub.f32 %v2096_v10, %v195_v24  ;;  %v207_v28 = vsel %vm108_vm1, %v201_v25, 0.0 }
 0x2b8   :  { %208 = vadd.xlane.f32.xlu1 %v207_v28  ;;  %v210_v29 = vsel %vm108_vm1, %v202_v26, 0.0 }
 0x2b9   :  { %211 = vadd.xlane.f32.xlu0 %v210_v29  ;;  %v203_v30 = vmul.f32 %v199_v27, %v199_v27 }
 0x2bb   :  { %v213_v31 = vsel %vm108_vm1, %v203_v30, 0.0 }
 0x2bc   :  { %214 = vadd.xlane.f32.xlu1 %v213_v31 }
 0x341   :  { %v206_v37 = vpop.xlane.xlu0 %205 }
 0x342   :  { %v216_v38 = vmul.f32 0.03125, %v206_v37 }
 0x344   :  { %v220_v39 = vadd.f32 1e-05, %v216_v38 }
 0x345   :  { %v209_v40 = vpop.xlane.xlu1 %208 }
 0x346   :  { %1950 = vrsqrt.f32 %v220_v39  ;;  %v217_v41 = vmul.f32 0.03125, %v209_v40  ;;  %v212_v42 = vpop.xlane.xlu0 %211 }
 0x347   :  { %v218_v43 = vmul.f32 0.03125, %v212_v42 }
 0x348   :  { %v221_v44 = vadd.f32 1e-05, %v217_v41  ;;  %v1662_v41 = vld [vmem:[%s2389_s2 + $0x29] ss:$0 sm:$0xff] }
 0x349   :  { %v222_v45 = vadd.f32 1e-05, %v218_v43  ;;  %v215_v46 = vpop.xlane.xlu1 %214 }
 0x34a   :  { %1952 = vrsqrt.f32 %v221_v44  ;;  %v219_v47 = vmul.f32 0.03125, %v215_v46 }
 0x34b   :  { %1954 = vrsqrt.f32 %v222_v45 }
 0x34c   :  { %v223_v48 = vadd.f32 1e-05, %v219_v47 }
 0x34e   :  { %1956 = vrsqrt.f32 %v223_v48 }
 0x350   :  { %v1951_v49 = vpop.eup %1950 }
 0x351   :  { %v228_v50 = vmul.f32 %v1951_v49, %v196_v14  ;;  %v1657_v14 = vld [vmem:[%s2389_s2 + $0x28] ss:$0 sm:$0xff] }
 0x353   :  { %v236_v55 = vmul.f32 %v1650_v51, %v228_v50 }
 0x354   :  { %v1953_v52 = vpop.eup %1952 }
 0x355   :  { %v1955_v53 = vpop.eup %1954  ;;  %v229_v54 = vmul.f32 %v1953_v52, %v197_v20  ;;  %v244_v63 = vadd.f32 %v1651_v57, %v236_v55 }
 0x356   :  { %v230_v56 = vmul.f32 %v1955_v53, %v198_v22 }
 0x357   :  { %v237_v58 = vmul.f32 %v1650_v51, %v229_v54 }
 0x358   :  { %v1957_v59 = vpop.eup %1956  ;;  %v238_v60 = vmul.f32 %v1650_v51, %v230_v56 }
 0x359   :  { %v231_v62 = vmul.f32 %v1957_v59, %v199_v27  ;;  %v245_v0 = vadd.f32 %v1651_v57, %v237_v58 }
 0x35a   :  { %v246_v3 = vadd.f32 %v1651_v57, %v238_v60 }
 0x35b   :  { %v239_v1 = vmul.f32 %v1650_v51, %v231_v62  ;;  %v248_v2 = vpack.c.bf16 %v245_v0, %v244_v63 }
 0x35d   :  { %1778 = vmatprep.mubr.msk.bf16.mxu0 %vm108_vm1, %v248_v2  ;;  %1786 = vmatprep.mubr.msk.bf16.mxu1 %vm108_vm1, %v248_v2  ;;  %v247_v5 = vadd.f32 %v1651_v57, %v239_v1 }
 0x35f   :  { %v249_v7 = vpack.c.bf16 %v247_v5, %v246_v3 }
 0x361   :  { %1779 = vmatmul.mubr.msk.bf16.vlgmr.msra.gmra.mrb[4].mxu0 %vm108_vm1, %v249_v7  ;;  %1787 = vmatmul.mubr.msk.bf16.vlgmr.msra.gmra.mrb[0].mxu1 %vm108_vm1, %v249_v7 }
 0x362   :  { %1791 = vmatpush3.bf16.msra.mxu0 %v1926_v36  ;;  %1794 = vmatprep.mubr.msk.bf16.mxu0 %vm108_vm1, %v248_v2 }
 0x363   :  { %1792 = vmatprep.subr.bf16.mxu0 %v1927_v8  ;;  %1800 = vmatprep.mubr.msk.bf16.mxu1 %vm2023_vm2, %v2022_v9 }
 0x366   :  { %1793 = vmatpush3.bf16.msra.mxu0 %v1927_v8 }
 0x367   :  { %1804 = vmatprep.subr.bf16.mxu0 %v2022_v9 }
 0x369   :  { %1795 = vmatmul.mubr.msk.bf16.vlgmr.msra.gmra.mrb[8].mxu0 %vm108_vm1, %v249_v7  ;;  %v470_v7 = vld [vmem:[%s2389_s2 + $0x10] sm:$0xff] }
 0x36a   :  { %1806 = vmatprep.mubr.msk.bf16.mxu0 %vm2023_vm2, %v2022_v9 }
 0x434   :  { %v1780_v12 = vpop.f32.mrb[4].mxu0  ;;  %v1788_v13 = vpop.f32.mrb[0].mxu1 }
 0x435   :  { %v320_v15 = vadd.f32 %v1780_v12, %v1652_v11  ;;  %v311_v18 = vpop.f32.mrb[5].mxu0  ;;  %v381_v19 = vpop.f32.mrb[1].mxu1  ;;  %v390_v23 = vadd.f32 %v1788_v13, %v1657_v14  ;;  %v471_v12 = vld [vmem:[%s2389_s2 + $0x18] sm:$0xff] }
 0x436   :  { %v312_v20 = vadd.f32 %v1652_v11, %v311_v18  ;;  %v1781_v21 = vpop.f32.mrb[6].mxu0  ;;  %v1789_v22 = vpop.f32.mrb[2].mxu1  ;;  %v382_v24 = vadd.f32 %v1657_v14, %v381_v19 }
 0x437   :  { %v323_v25 = vadd.f32 %v1781_v21, %v1652_v11  ;;  %v393_v26 = vadd.f32 %v1789_v22, %v1657_v14  ;;  %v314_v27 = vpop.f32.mrb[7].mxu0  ;;  %v384_v28 = vpop.f32.mrb[3].mxu1  ;;  %v579_v29 = vmul.f32 %v1667_v16, %v320_v15  ;;  %v629_v30 = vmul.f32 %v1669_v17, %v320_v15 }
 0x438   :  { %v315_v31 = vadd.f32 %v1652_v11, %v314_v27  ;;  %v385_v32 = vadd.f32 %v1657_v14, %v384_v28  ;;  %v477_v33 = vmul.f32 %v1667_v16, %v312_v20  ;;  %v531_v37 = vmul.f32 %v1669_v17, %v312_v20 }
 0x439   :  { %v580_v34 = vmul.f32 %v1667_v16, %v323_v25  ;;  %v630_v35 = vmul.f32 %v1669_v17, %v323_v25  ;;  %v578_v36 = vpack.c.bf16 %v393_v26, %v390_v23  ;;  %v468_v23 = vld [vmem:[%s2389_s2] sm:$0xff] }
 0x43a   :  { %v478_v38 = vmul.f32 %v1667_v16, %v315_v31  ;;  %v532_v39 = vmul.f32 %v1669_v17, %v315_v31  ;;  %v472_v40 = vpack.c.bf16 %v385_v32, %v382_v24 }
 0x43b   :  { %v581_v42 = vpack.c.bf16 %v580_v34, %v579_v29  ;;  %v631_v43 = vpack.c.bf16 %v630_v35, %v629_v30  ;;  %v586_v5 = vsel %vm108_vm1, %v578_v36, 0  ;;  %v469_v29 = vld [vmem:[%s2389_s2 + $0x8] sm:$0xff] }
 0x43c   :  { %v479_v44 = vpack.c.bf16 %v478_v38, %v477_v33  ;;  %v533_v45 = vpack.c.bf16 %v532_v39, %v531_v37  ;;  %v1796_v46 = vpop.f32.mrb[8].mxu0  ;;  %v484_v47 = vsel %vm108_vm1, %v472_v40, 0 }
 0x43d   :  { %v460_v48 = vadd.f32 %v1796_v46, %v1662_v41  ;;  %v451_v49 = vpop.f32.mrb[9].mxu0  ;;  %1799 = vmatpush3.bf16.xpose.msra.mxu1 %v484_v47  ;;  %1805 = vmatpush3.bf16.xpose.msra.mxu0 %v484_v47 }
 0x43e   :  { %v452_v50 = vadd.f32 %v1662_v41, %v451_v49  ;;  %v1797_v51 = vpop.f32.mrb[10].mxu0  ;;  %1810 = vmatprep.subr.bf16.mxu1 %v2022_v9  ;;  %1816 = vmatprep.subr.bf16.mxu0 %v2022_v9 }
 0x43f   :  { %v2162_v52 = vmul.f32 %v1667_v16, %v460_v48  ;;  %v463_v53 = vadd.f32 %v1797_v51, %v1662_v41  ;;  %v454_v54 = vpop.f32.mrb[11].mxu0  ;;  %v866_v57 = vmul.f32 %v1669_v17, %v460_v48 }
 0x440   :  { %v2164_v55 = vmul.f32 %v1667_v16, %v452_v50  ;;  %v455_v56 = vadd.f32 %v1662_v41, %v454_v54  ;;  %v770_v60 = vmul.f32 %v1669_v17, %v452_v50 }
 0x441   :  { %v2166_v58 = vmul.f32 %v1667_v16, %v463_v53  ;;  %v867_v59 = vmul.f32 %v1669_v17, %v463_v53 }
 0x442   :  { %v2168_v62 = vmul.f32 %v1667_v16, %v455_v56  ;;  %v771_v63 = vmul.f32 %v1669_v17, %v455_v56 }
 0x443   :  { %v864_v0 = vpack.c.bf16 %v2166_v58, %v2162_v52  ;;  %v868_v1 = vpack.c.bf16 %v867_v59, %v866_v57  ;;  %v1929_v52 = vld [vmem:[%s2387_s1 + $0x50] sm:$0xff]  }
 0x444   :  { %v768_v2 = vpack.c.bf16 %v2168_v62, %v2164_v55  ;;  %v772_v3 = vpack.c.bf16 %v771_v63, %v770_v60  ;;  %1801 = vmatmul.mubr.msk.bf16.vlgmr.msra.gmra.mrb[4].mxu1 %vm108_vm1, %v479_v44  ;;  %1807 = vmatmul.mubr.msk.bf16.vlgmr.msra.gmra.mrb[12].mxu0 %vm108_vm1, %v533_v45 }
 0x445   :  { %1811 = vmatpush3.bf16.xpose.msra.mxu1 %v586_v5  ;;  %1817 = vmatpush3.bf16.xpose.msra.mxu0 %v586_v5 }
 0x446   :  { %1812 = vmatprep.mubr.msk.bf16.mxu1 %vm2023_vm2, %v2022_v9  ;;  %1818 = vmatprep.mubr.msk.bf16.mxu0 %vm2023_vm2, %v2022_v9 }
 0x447   :  { %1822 = vmatprep.subr.bf16.mxu1 %v2022_v9  ;;  %1834 = vmatprep.subr.bf16.mxu0 %v2022_v9 }
 0x44c   :  { %1813 = vmatmul.mubr.msk.bf16.vlgmr.msra.gmra.mrb[8].mxu1 %vm108_vm1, %v581_v42  ;;  %1819 = vmatmul.mubr.msk.bf16.vlgmr.msra.gmra.mrb[16].mxu0 %vm108_vm1, %v631_v43 }
 0x44d   :  { %1823 = vmatpush3.bf16.msra.mxu1 %v772_v3  ;;  %1835 = vmatpush3.bf16.msra.mxu0 %v868_v1 }
 0x44e   :  { %1824 = vmatprep.mubr.msk.bf16.mxu1 %vm2023_vm2, %v2022_v9  ;;  %1828 = vmatprep.subr.bf16.mxu1 %v2022_v9 }
 0x44f   :  { %1836 = vmatprep.mubr.msk.bf16.mxu0 %vm2023_vm2, %v2022_v9  ;;  %1840 = vmatprep.subr.bf16.mxu0 %v2022_v9 }
 0x517   :  { %v520_v8 = vpop.f32.mrb[4].mxu1  ;;  %v571_v11 = vpop.f32.mrb[12].mxu0 }
 0x518   :  { %v572_v13 = vadd.f32 %v571_v11, %v470_v7  ;;  %v1802_v14 = vpop.f32.mrb[5].mxu1  ;;  %v1808_v15 = vpop.f32.mrb[13].mxu0  ;;  %v521_v32 = vadd.f32 %v520_v8, %v468_v23 }
 0x519   :  { %v523_v16 = vpop.f32.mrb[6].mxu1  ;;  %v574_v17 = vpop.f32.mrb[14].mxu0 }
 0x51a   :  { %v575_v18 = vadd.f32 %v574_v17, %v471_v12  ;;  %v1803_v19 = vpop.f32.mrb[7].mxu1  ;;  %v1809_v20 = vpop.f32.mrb[15].mxu0  ;;  %v683_v21 = vsel %vm676_vm3, %v572_v13, -inf  ;;  %v524_v37 = vadd.f32 %v523_v16, %v469_v29  ;;  %v677_v40 = vsel %vm676_vm3, %v521_v32, -inf }
 0x51b   :  { %684 = vmax.xlane.f32.xlu0 %v683_v21 }
 0x51c   :  { %v686_v22 = vsel %vm676_vm3, %v575_v18, -inf  ;;  %v680_v42 = vsel %vm676_vm3, %v524_v37, -inf }
 0x51d   :  { %687 = vmax.xlane.f32.xlu1 %v686_v22 }
 0x51f   :  { %v622_v24 = vpop.f32.mrb[8].mxu1  ;;  %v669_v25 = vpop.f32.mrb[16].mxu0 }
 0x520   :  { %v670_v26 = vadd.f32 %v669_v25, %v470_v7  ;;  %v1814_v27 = vpop.f32.mrb[9].mxu1  ;;  %v1820_v28 = vpop.f32.mrb[17].mxu0  ;;  %v623_v39 = vadd.f32 %v622_v24, %v468_v23 }
 0x521   :  { %v625_v30 = vpop.f32.mrb[10].mxu1  ;;  %v672_v31 = vpop.f32.mrb[18].mxu0 }
 0x522   :  { %v673_v33 = vadd.f32 %v672_v31, %v471_v12  ;;  %v1815_v34 = vpop.f32.mrb[11].mxu1  ;;  %v1821_v35 = vpop.f32.mrb[19].mxu0  ;;  %v695_v36 = vsel %vm676_vm3, %v670_v26, -inf  ;;  %v626_v41 = vadd.f32 %v625_v30, %v469_v29  ;;  %v689_v43 = vsel %vm676_vm3, %v623_v39, -inf }
 0x523   :  { %696 = vmax.xlane.f32.xlu0 %v695_v36 }
 0x524   :  { %v698_v38 = vsel %vm676_vm3, %v673_v33, -inf  ;;  %v692_v44 = vsel %vm676_vm3, %v626_v41, -inf }
 0x525   :  { %699 = vmax.xlane.f32.xlu1 %v698_v38 }
 0x527   :  { %678 = vmax.xlane.f32.xlu0 %v677_v40 }
 0x529   :  { %681 = vmax.xlane.f32.xlu1 %v680_v42 }
 0x52b   :  { %690 = vmax.xlane.f32.xlu0 %v689_v43 }
 0x52d   :  { %693 = vmax.xlane.f32.xlu1 %v692_v44 }
 0x5a8   :  { %v685_v45 = vpop.xlane.xlu0 %684 }
 0x5a9   :  { %v703_v46 = vsub.f32 %v572_v13, %v685_v45 }
 0x5aa   :  { %v688_v47 = vpop.xlane.xlu1 %687 }
 0x5ab   :  { %v713_v48 = vmul.f32 1.442695, %v703_v46  ;;  %v704_v49 = vsub.f32 %v575_v18, %v688_v47 }
 0x5ad   :  { %1958 = vpow2.f32 %v713_v48  ;;  %v715_v50 = vmul.f32 1.442695, %v704_v49 }
 0x5af   :  { %1960 = vpow2.f32 %v715_v50 }
 0x5b0   :  { %v697_v51 = vpop.xlane.xlu0 %696 }
 0x5b1   :  { %v707_v53 = vsub.f32 %v670_v26, %v697_v51 }
 0x5b2   :  { %v700_v54 = vpop.xlane.xlu1 %699 }
 0x5b3   :  { %v721_v56 = vmul.f32 1.442695, %v707_v53  ;;  %v708_v57 = vsub.f32 %v673_v33, %v700_v54 }
 0x5b4   :  { %v679_v59 = vpop.xlane.xlu0 %678 }
 0x5b5   :  { %1962 = vpow2.f32 %v721_v56  ;;  %v723_v60 = vmul.f32 1.442695, %v708_v57  ;;  %v701_v63 = vsub.f32 %v521_v32, %v679_v59 }
 0x5b6   :  { %v682_v1 = vpop.xlane.xlu1 %681 }
 0x5b7   :  { %v1959_v3 = vpop.eup %1958  ;;  %1964 = vpow2.f32 %v723_v60  ;;  %v709_v5 = vmul.f32 1.442695, %v701_v63  ;;  %v702_v7 = vsub.f32 %v524_v37, %v682_v1  ;;  %v1928_v60 = vld [vmem:[%s2387_s1 + $0x48] sm:$0xff]  }
 0x5b8   :  { %v691_v8 = vpop.xlane.xlu0 %690  ;;  %v731_v11 = vsel %vm676_vm3, %v1959_v3, 0.0 }
 0x5b9   :  { %v1961_v12 = vpop.eup %1960  ;;  %1966 = vpow2.f32 %v709_v5  ;;  %v711_v13 = vmul.f32 1.442695, %v702_v7  ;;  %v705_v14 = vsub.f32 %v623_v39, %v691_v8  ;;  %732 = vadd.xlane.f32.xlu0 %v731_v11 }
 0x5ba   :  { %v694_v15 = vpop.xlane.xlu1 %693  ;;  %v734_v16 = vsel %vm676_vm3, %v1961_v12, 0.0 }
 0x5bb   :  { %1968 = vpow2.f32 %v711_v13  ;;  %v717_v17 = vmul.f32 1.442695, %v705_v14  ;;  %v706_v18 = vsub.f32 %v626_v41, %v694_v15  ;;  %735 = vadd.xlane.f32.xlu1 %v734_v16  ;;  %v1677_v13 = vld [vmem:[%s2389_s2 + $0x2a] ss:$0 sm:$0xff] }
 0x5bd   :  { %1970 = vpow2.f32 %v717_v17  ;;  %v719_v19 = vmul.f32 1.442695, %v706_v18 }
 0x5bf   :  { %v1963_v20 = vpop.eup %1962  ;;  %1972 = vpow2.f32 %v719_v19 }
 0x5c0   :  { %v743_v21 = vsel %vm676_vm3, %v1963_v20, 0.0 }
 0x5c1   :  { %v1965_v22 = vpop.eup %1964  ;;  %744 = vadd.xlane.f32.xlu0 %v743_v21 }
 0x5c2   :  { %v746_v23 = vsel %vm676_vm3, %v1965_v22, 0.0 }
 0x5c3   :  { %v1967_v24 = vpop.eup %1966  ;;  %747 = vadd.xlane.f32.xlu1 %v746_v23 }
 0x5c4   :  { %v725_v25 = vsel %vm676_vm3, %v1967_v24, 0.0 }
 0x5c5   :  { %v1969_v26 = vpop.eup %1968  ;;  %726 = vadd.xlane.f32.xlu0 %v725_v25 }
 0x5c6   :  { %v728_v27 = vsel %vm676_vm3, %v1969_v26, 0.0 }
 0x5c7   :  { %v1971_v28 = vpop.eup %1970  ;;  %729 = vadd.xlane.f32.xlu1 %v728_v27 }
 0x5c8   :  { %v737_v29 = vsel %vm676_vm3, %v1971_v28, 0.0 }
 0x5c9   :  { %v1973_v30 = vpop.eup %1972  ;;  %738 = vadd.xlane.f32.xlu0 %v737_v29 }
 0x5ca   :  { %v740_v31 = vsel %vm676_vm3, %v1973_v30, 0.0 }
 0x5cb   :  { %741 = vadd.xlane.f32.xlu1 %v740_v31 }
 0x646   :  { %v733_v32 = vpop.xlane.xlu0 %732 }
 0x647   :  { %1974 = vrcp.f32 %v733_v32 }
 0x648   :  { %v736_v33 = vpop.xlane.xlu1 %735 }
 0x649   :  { %1976 = vrcp.f32 %v736_v33 }
 0x64e   :  { %v745_v34 = vpop.xlane.xlu0 %744 }
 0x64f   :  { %1978 = vrcp.f32 %v745_v34 }
 0x650   :  { %v748_v35 = vpop.xlane.xlu1 %747 }
 0x651   :  { %v1975_v36 = vpop.eup %1974  ;;  %1980 = vrcp.f32 %v748_v35 }
 0x652   :  { %v727_v37 = vpop.xlane.xlu0 %726  ;;  %v754_v39 = vmul.f32 %v1975_v36, %v1959_v3 }
 0x653   :  { %v1977_v38 = vpop.eup %1976  ;;  %1982 = vrcp.f32 %v727_v37 }
 0x654   :  { %v756_v40 = vmul.f32 %v1977_v38, %v1961_v12  ;;  %v730_v41 = vpop.xlane.xlu1 %729 }
 0x655   :  { %1984 = vrcp.f32 %v730_v41 }
 0x656   :  { %v769_v42 = vpack.c.bf16 %v756_v40, %v754_v39  ;;  %v739_v43 = vpop.xlane.xlu0 %738 }
 0x658   :  { %1825 = vmatmul.mubr.msk.bf16.vlgmr.msra.gmra.mrb[12].mxu1 %vm676_vm3, %v769_v42  ;;  %v742_v44 = vpop.xlane.xlu1 %741 }
 0x659   :  { %v1979_v45 = vpop.eup %1978  ;;  %1829 = vmatpush3.bf16.msra.mxu1 %v768_v2  ;;  %1986 = vrcp.f32 %v742_v44  ;;  %1830 = vmatprep.mubr.msk.bf16.mxu1 %vm2023_vm2, %v2022_v9 }
 0x65a   :  { %1988 = vrcp.f32 %v739_v43  ;;  %v762_v47 = vmul.f32 %v1979_v45, %v1963_v20  ;;  %1846 = vmatprep.subr.bf16.mxu1 %v1928_v60 }
 0x65b   :  { %v1981_v46 = vpop.eup %1980 }
 0x65c   :  { %v764_v48 = vmul.f32 %v1981_v46, %v1965_v22  ;;  %v1930_v46 = vld [vmem:[%s2387_s1 + $0x58] sm:$0xff]  }
 0x65d   :  { %v1983_v49 = vpop.eup %1982 }
 0x65e   :  { %v865_v50 = vpack.c.bf16 %v764_v48, %v762_v47  ;;  %v750_v53 = vmul.f32 %v1983_v49, %v1967_v24  ;;  %v1931_v47 = vld [vmem:[%s2387_s1 + $0x60] sm:$0xff]  }
 0x65f   :  { %v1985_v51 = vpop.eup %1984 }
 0x660   :  { %v752_v54 = vmul.f32 %v1985_v51, %v1969_v26  ;;  %1837 = vmatmul.mubr.msk.bf16.vlgmr.msra.gmra.mrb[20].mxu0 %vm676_vm3, %v865_v50 }
 0x661   :  { %1841 = vmatpush3.bf16.msra.mxu0 %v864_v0  ;;  %1842 = vmatprep.mubr.msk.bf16.mxu0 %vm2023_vm2, %v2022_v9 }
 0x662   :  { %v765_v55 = vpack.c.bf16 %v752_v54, %v750_v53  ;;  %1854 = vmatprep.subr.bf16.mxu0 %v1930_v46 }
 0x663   :  { %v1987_v62 = vpop.eup %1986 }
 0x664   :  { %1831 = vmatmul.mubr.msk.bf16.vlgmr.msra.gmra.mrb[12].mxu1 %vm676_vm3, %v765_v55  ;;  %v1989_v2 = vpop.eup %1988  ;;  %v760_v56 = vmul.f32 %v1987_v62, %v1973_v30 }
 0x665   :  { %v758_v57 = vmul.f32 %v1989_v2, %v1971_v28  ;;  %1847 = vmatpush3.bf16.msra.mxu1 %v1928_v60 }
 0x666   :  { %1848 = vmatprep.subr.bf16.mxu1 %v1929_v52 }
 0x667   :  { %v861_v59 = vpack.c.bf16 %v760_v56, %v758_v57 }
 0x669   :  { %1849 = vmatpush3.bf16.msra.mxu1 %v1929_v52  ;;  %v1682_v52 = vld [vmem:[%s2389_s2 + $0x2b] ss:$0 sm:$0xff] }
 0x66c   :  { %1843 = vmatmul.mubr.msk.bf16.vlgmr.msra.gmra.mrb[20].mxu0 %vm676_vm3, %v861_v59 }
 0x66d   :  { %1855 = vmatpush3.bf16.msra.mxu0 %v1930_v46 }
 0x66e   :  { %1856 = vmatprep.subr.bf16.mxu0 %v1931_v47 }
 0x671   :  { %1857 = vmatpush3.bf16.msra.mxu0 %v1931_v47 }
 0x737   :  { %v854_v58 = vpop.f32.mrb[12].mxu1 }
 0x738   :  { %v1832_v0 = vpop.f32.mrb[13].mxu1 }
 0x739   :  { %v857_v63 = vpop.f32.mrb[14].mxu1 }
 0x73a   :  { %v957_v1 = vpack.c.bf16 %v857_v63, %v854_v58  ;;  %v1833_v3 = vpop.f32.mrb[15].mxu1 }
 0x73c   :  { %1850 = vmatprep.mubr.msk.bf16.mxu1 %vm108_vm1, %v957_v1 }
 0x73f   :  { %v950_v5 = vpop.f32.mrb[20].mxu0 }
 0x740   :  { %v1844_v7 = vpop.f32.mrb[21].mxu0 }
 0x741   :  { %v953_v8 = vpop.f32.mrb[22].mxu0 }
 0x742   :  { %v958_v11 = vpack.c.bf16 %v953_v8, %v950_v5  ;;  %v1845_v12 = vpop.f32.mrb[23].mxu0  ;;  %v1683_v5 = vld [vmem:[%s2389_s2 + $0x2c] ss:$0 sm:$0xff] }
 0x744   :  { %1851 = vmatmul.mubr.msk.bf16.vlgmr.msra.gmra.mrb[16].mxu1 %vm108_vm1, %v958_v11 }
 0x817   :  { %v1852_v14 = vpop.f32.mrb[16].mxu1 }
 0x818   :  { %v1020_v15 = vpop.f32.mrb[17].mxu1  ;;  %v1029_v16 = vadd.f32 %v1852_v14, %v1677_v13 }
 0x819   :  { %v1021_v17 = vadd.f32 %v1677_v13, %v1020_v15  ;;  %v1853_v18 = vpop.f32.mrb[18].mxu1 }
 0x81a   :  { %v1023_v19 = vpop.f32.mrb[19].mxu1  ;;  %v1032_v21 = vadd.f32 %v1853_v18, %v1677_v13  ;;  %v2248_v23 = vadd.f32 %v1029_v16, %v2090_v6 }
 0x81b   :  { %v2245_v20 = vadd.f32 %v1021_v17, %v2084_v61  ;;  %v1024_v22 = vadd.f32 %v1677_v13, %v1023_v19 }
 0x81c   :  { %v2256_v26 = vadd.f32 %v1032_v21, %v2096_v10  ;;  %v1047_v61 = vsel %vm108_vm1, %v2248_v23, 0.0 }
 0x81d   :  { %v2251_v24 = vadd.f32 %v1024_v22, %v2088_v4  ;;  %v1041_v25 = vsel %vm108_vm1, %v2245_v20, 0.0  ;;  %v1932_v22 = vld [vmem:[%s2387_s1 + $0x68] sm:$0xff]  }
 0x81e   :  { %1042 = vadd.xlane.f32.xlu0 %v1041_v25  ;;  %v1050_v6 = vsel %vm108_vm1, %v2256_v26, 0.0  ;;  %1862 = vmatprep.subr.bf16.mxu1 %v1932_v22  ;;  %v1933_v25 = vld [vmem:[%s2387_s1 + $0x70] sm:$0xff]  }
 0x81f   :  { %v1044_v27 = vsel %vm108_vm1, %v2251_v24, 0.0  ;;  %1863 = vmatpush3.bf16.msra.mxu1 %v1932_v22 }
 0x820   :  { %1045 = vadd.xlane.f32.xlu1 %v1044_v27  ;;  %1864 = vmatprep.subr.bf16.mxu1 %v1933_v25  ;;  %v1934_v27 = vld [vmem:[%s2387_s1 + $0x78] sm:$0xff]  }
 0x822   :  { %1048 = vadd.xlane.f32.xlu0 %v1047_v61  ;;  %v1935_v61 = vld [vmem:[%s2387_s1 + $0x80] sm:$0xff]  }
 0x823   :  { %1865 = vmatpush3.bf16.msra.mxu1 %v1933_v25 }
 0x824   :  { %1051 = vadd.xlane.f32.xlu1 %v1050_v6  ;;  %1866 = vmatprep.subr.bf16.mxu1 %v1934_v27  ;;  %v1936_v6 = vld [vmem:[%s2387_s1 + $0x88] sm:$0xff]  }
 0x827   :  { %1867 = vmatpush3.bf16.msra.mxu1 %v1934_v27 }
 0x828   :  { %1868 = vmatprep.subr.bf16.mxu1 %v1935_v61 }
 0x82b   :  { %1869 = vmatpush3.bf16.msra.mxu1 %v1935_v61 }
 0x82c   :  { %1870 = vmatprep.subr.bf16.mxu1 %v1936_v6 }
 0x82f   :  { %1871 = vmatpush3.bf16.msra.mxu1 %v1936_v6 }
 0x8ab   :  { %v1043_v4 = vpop.xlane.xlu0 %1042 }
 0x8ac   :  { %v1053_v28 = vmul.f32 0.03125, %v1043_v4  ;;  %v1937_v4 = vld [vmem:[%s2387_s1 + $0x90] sm:$0xff]  }
 0x8ad   :  { %v1046_v29 = vpop.xlane.xlu1 %1045  ;;  %1872 = vmatprep.subr.bf16.mxu1 %v1937_v4 }
 0x8ae   :  { %v1057_v30 = vsub.f32 %v2245_v20, %v1053_v28  ;;  %v1054_v31 = vmul.f32 0.03125, %v1046_v29  ;;  %1873 = vmatpush3.bf16.msra.mxu1 %v1937_v4  ;;  %v1938_v28 = vld [vmem:[%s2387_s1 + $0x98] sm:$0xff]   ;;  %v1939_v29 = vld [vmem:[%s2387_s1 + $0xa0] sm:$0xff]  }
 0x8af   :  { %v1049_v10 = vpop.xlane.xlu0 %1048  ;;  %1874 = vmatprep.subr.bf16.mxu1 %v1938_v28 }
 0x8b0   :  { %v1058_v32 = vsub.f32 %v2251_v24, %v1054_v31  ;;  %v1055_v33 = vmul.f32 0.03125, %v1049_v10  ;;  %v1061_v34 = vmul.f32 %v1057_v30, %v1057_v30 }
 0x8b1   :  { %v1052_v35 = vpop.xlane.xlu1 %1051 }
 0x8b2   :  { %v1059_v36 = vsub.f32 %v2248_v23, %v1055_v33  ;;  %v1056_v37 = vmul.f32 0.03125, %v1052_v35  ;;  %v1065_v38 = vsel %vm108_vm1, %v1061_v34, 0.0  ;;  %v1062_v39 = vmul.f32 %v1058_v32, %v1058_v32  ;;  %1875 = vmatpush3.bf16.msra.mxu1 %v1938_v28 }
 0x8b3   :  { %1066 = vadd.xlane.f32.xlu0 %v1065_v38  ;;  %1876 = vmatprep.subr.bf16.mxu1 %v1939_v29 }
 0x8b4   :  { %v1060_v40 = vsub.f32 %v2256_v26, %v1056_v37  ;;  %v1068_v41 = vsel %vm108_vm1, %v1062_v39, 0.0  ;;  %v1063_v42 = vmul.f32 %v1059_v36, %v1059_v36 }
 0x8b5   :  { %1069 = vadd.xlane.f32.xlu1 %v1068_v41 }
 0x8b6   :  { %v1071_v43 = vsel %vm108_vm1, %v1063_v42, 0.0  ;;  %v1064_v44 = vmul.f32 %v1060_v40, %v1060_v40  ;;  %1877 = vmatpush3.bf16.msra.mxu1 %v1939_v29 }
 0x8b7   :  { %1072 = vadd.xlane.f32.xlu0 %v1071_v43 }
 0x8b8   :  { %v1074_v45 = vsel %vm108_vm1, %v1064_v44, 0.0 }
 0x8b9   :  { %1075 = vadd.xlane.f32.xlu1 %v1074_v45 }
 0x940   :  { %v1067_v48 = vpop.xlane.xlu0 %1066 }
 0x941   :  { %v1077_v49 = vmul.f32 0.03125, %v1067_v48 }
 0x942   :  { %v1070_v50 = vpop.xlane.xlu1 %1069 }
 0x943   :  { %v1081_v51 = vadd.f32 1e-05, %v1077_v49  ;;  %v1078_v53 = vmul.f32 0.03125, %v1070_v50 }
 0x944   :  { %v1073_v54 = vpop.xlane.xlu0 %1072 }
 0x945   :  { %1990 = vrsqrt.f32 %v1081_v51  ;;  %v1082_v55 = vadd.f32 1e-05, %v1078_v53  ;;  %v1079_v62 = vmul.f32 0.03125, %v1073_v54 }
 0x946   :  { %v1076_v2 = vpop.xlane.xlu1 %1075 }
 0x947   :  { %1992 = vrsqrt.f32 %v1082_v55  ;;  %v1083_v56 = vadd.f32 1e-05, %v1079_v62  ;;  %v1080_v57 = vmul.f32 0.03125, %v1076_v2 }
 0x949   :  { %1994 = vrsqrt.f32 %v1083_v56  ;;  %v1084_v59 = vadd.f32 1e-05, %v1080_v57 }
 0x94b   :  { %1996 = vrsqrt.f32 %v1084_v59 }
 0x94f   :  { %v1991_v60 = vpop.eup %1990 }
 0x950   :  { %v1089_v58 = vmul.f32 %v1991_v60, %v1057_v30  ;;  %v1684_v30 = vld [vmem:[%s2389_s2 + $0x2d] ss:$0 sm:$0xff] }
 0x951   :  { %v1993_v0 = vpop.eup %1992 }
 0x952   :  { %v1090_v63 = vmul.f32 %v1993_v0, %v1058_v32  ;;  %v1097_v1 = vmul.f32 %v1682_v52, %v1089_v58 }
 0x953   :  { %v1995_v3 = vpop.eup %1994 }
 0x954   :  { %v1091_v7 = vmul.f32 %v1995_v3, %v1059_v36  ;;  %v1098_v8 = vmul.f32 %v1682_v52, %v1090_v63  ;;  %v1105_v14 = vadd.f32 %v1683_v5, %v1097_v1 }
 0x955   :  { %v1997_v11 = vpop.eup %1996 }
 0x956   :  { %v1099_v12 = vmul.f32 %v1682_v52, %v1091_v7  ;;  %v1092_v13 = vmul.f32 %v1997_v11, %v1060_v40  ;;  %v1106_v15 = vadd.f32 %v1683_v5, %v1098_v8 }
 0x958   :  { %v1100_v16 = vmul.f32 %v1682_v52, %v1092_v13  ;;  %v1109_v17 = vpack.c.bf16 %v1106_v15, %v1105_v14  ;;  %v1107_v18 = vadd.f32 %v1683_v5, %v1099_v12 }
 0x95a   :  { %1858 = vmatprep.mubr.msk.bf16.mxu0 %vm108_vm1, %v1109_v17  ;;  %v1108_v19 = vadd.f32 %v1683_v5, %v1100_v16 }
 0x95c   :  { %v1110_v21 = vpack.c.bf16 %v1108_v19, %v1107_v18 }
 0x95e   :  { %1859 = vmatmul.mubr.msk.bf16.vlgmr.msra.gmra.mrb[24].mxu0 %vm108_vm1, %v1110_v21 }
 0x95f   :  { %1890 = vmatprep.mubr.msk.f32.mxu0 %vm2023_vm2, %v2022_v9 }
 0xa31   :  { %v1860_v31 = vpop.f32.mrb[24].mxu0 }
 0xa32   :  { %v2315_v10 = vadd.f32 %v1860_v31, %v1684_v30  ;;  %v1172_v32 = vpop.f32.mrb[25].mxu0 }
 0xa33   :  { %v2317_v33 = vadd.f32 %v1684_v30, %v1172_v32  ;;  %v1861_v34 = vpop.f32.mrb[26].mxu0 }
 0xa34   :  { %v2320_v35 = vmul.f32 0.70710677, %v2315_v10  ;;  %v2322_v36 = vadd.f32 %v1861_v34, %v1684_v30  ;;  %v1175_v37 = vpop.f32.mrb[27].mxu0 }
 0xa35   :  { %v2325_v38 = vmul.f32 0.70710677, %v2317_v33  ;;  %v2331_v41 = vadd.f32 %v1684_v30, %v1175_v37 }
 0xa36   :  { %v1205_v39 = vand.u32 2147483647, %v2320_v35  ;;  %v2329_v40 = vmul.f32 0.70710677, %v2322_v36  ;;  %vm1197_vm4 = vcmp.ge.f32.partialorder %v2320_v35, 0.0 }
 0xa37   :  { %v1203_v42 = vand.u32 2147483647, %v2325_v38  ;;  %v2336_v47 = vmul.f32 0.70710677, %v2331_v41  ;;  %vm1195_vm5 = vcmp.ge.f32.partialorder %v2325_v38, 0.0 }
 0xa38   :  { %v1209_v43 = vmul.f32 0.3275911, %v1205_v39  ;;  %v1206_v45 = vand.u32 2147483647, %v2329_v40  ;;  %v1261_v55 = vsub.f32 0.0, %v1205_v39  ;;  %vm1198_vm6 = vcmp.ge.f32.partialorder %v2329_v40, 0.0 }
 0xa39   :  { %v1207_v44 = vmul.f32 0.3275911, %v1203_v42  ;;  %v1204_v50 = vand.u32 2147483647, %v2336_v47  ;;  %v1259_v62 = vsub.f32 0.0, %v1203_v42  ;;  %vm1196_vm7 = vcmp.ge.f32.partialorder %v2336_v47, 0.0 }
 0xa3a   :  { %v1213_v46 = vadd.f32 1.0, %v1209_v43  ;;  %v1210_v49 = vmul.f32 0.3275911, %v1206_v45  ;;  %v1265_v56 = vmul.f32 %v1261_v55, %v1205_v39  ;;  %v1262_v57 = vsub.f32 0.0, %v1206_v45 }
 0xa3b   :  { %v1211_v48 = vadd.f32 1.0, %v1207_v44  ;;  %v1208_v53 = vmul.f32 0.3275911, %v1204_v50  ;;  %v1263_v52 = vmul.f32 %v1259_v62, %v1203_v42  ;;  %v1260_v0 = vsub.f32 0.0, %v1204_v50 }
 0xa3c   :  { %1998 = vrcp.f32 %v1213_v46  ;;  %v1214_v51 = vadd.f32 1.0, %v1210_v49  ;;  %v1271_v3 = vmul.f32 1.442695, %v1265_v56  ;;  %v1266_v7 = vmul.f32 %v1262_v57, %v1206_v45 }
 0xa3d   :  { %2000 = vrcp.f32 %v1211_v48  ;;  %v1212_v54 = vadd.f32 1.0, %v1208_v53  ;;  %v1267_v11 = vmul.f32 1.442695, %v1263_v52  ;;  %v1264_v15 = vmul.f32 %v1260_v0, %v1204_v50 }
 0xa3e   :  { %2002 = vrcp.f32 %v1214_v51  ;;  %v1273_v21 = vmul.f32 1.442695, %v1266_v7 }
 0xa3f   :  { %2004 = vrcp.f32 %v1212_v54  ;;  %v1269_v6 = vmul.f32 1.442695, %v1264_v15  ;;  %v1189_v15 = vmul.f32 0.5, %v2315_v10  ;;  %v1689_v10 = vld [vmem:[%s2389_s2 + $0x2e] ss:$0 sm:$0xff] }
 0xa40   :  { %2006 = vpow2.f32 %v1271_v3 }
 0xa41   :  { %2008 = vpow2.f32 %v1267_v11 }
 0xa42   :  { %2010 = vpow2.f32 %v1273_v21 }
 0xa43   :  { %2012 = vpow2.f32 %v1269_v6 }
 0xa46   :  { %v1999_v2 = vpop.eup %1998 }
 0xa47   :  { %v2001_v59 = vpop.eup %2000  ;;  %v1225_v60 = vmul.f32 1.0614054, %v1999_v2 }
 0xa48   :  { %v1223_v58 = vmul.f32 1.0614054, %v2001_v59  ;;  %v2003_v1 = vpop.eup %2002 }
 0xa49   :  { %v1229_v63 = vadd.f32 -1.4531521, %v1225_v60  ;;  %v1226_v12 = vmul.f32 1.0614054, %v2003_v1  ;;  %v2005_v13 = vpop.eup %2004 }
 0xa4a   :  { %v1227_v5 = vadd.f32 -1.4531521, %v1223_v58  ;;  %v1224_v18 = vmul.f32 1.0614054, %v2005_v13  ;;  %v2007_v49 = vpop.eup %2006  ;;  %v2024_v58 = vmov -1.0  }
 0xa4b   :  { %v1233_v8 = vmul.f32 %v1999_v2, %v1229_v63  ;;  %v1230_v17 = vadd.f32 -1.4531521, %v1226_v12  ;;  %v2009_v51 = vpop.eup %2008  ;;  %v1201_v0 = vsel %vm1197_vm4, 1.0, %v2024_v58  ;;  %v1199_v35 = vsel %vm1195_vm5, 1.0, %v2024_v58 }
 0xa4c   :  { %v1231_v14 = vmul.f32 %v2001_v59, %v1227_v5  ;;  %v1228_v27 = vadd.f32 -1.4531521, %v1224_v18  ;;  %v2011_v52 = vpop.eup %2010  ;;  %v1202_v12 = vsel %vm1198_vm6, 1.0, %v2024_v58  ;;  %v1190_v18 = vmul.f32 0.5, %v2322_v36 }
 0xa4d   :  { %v1237_v16 = vadd.f32 1.4214138, %v1233_v8  ;;  %v1234_v25 = vmul.f32 %v2003_v1, %v1230_v17  ;;  %v2013_v5 = vpop.eup %2012 }
 0xa4e   :  { %v1235_v19 = vadd.f32 1.4214138, %v1231_v14  ;;  %v1232_v29 = vmul.f32 %v2005_v13, %v1228_v27 }
 0xa4f   :  { %v1241_v22 = vmul.f32 %v1999_v2, %v1237_v16  ;;  %v1238_v28 = vadd.f32 1.4214138, %v1234_v25  ;;  %v1200_v16 = vsel %vm1196_vm7, 1.0, %v2024_v58  ;;  %v1188_v25 = vmul.f32 0.5, %v2331_v41 }
 0xa50   :  { %v1239_v61 = vmul.f32 %v2001_v59, %v1235_v19  ;;  %v1236_v34 = vadd.f32 1.4214138, %v1232_v29 }
 0xa51   :  { %v1245_v4 = vadd.f32 -0.28449672, %v1241_v22  ;;  %v1242_v32 = vmul.f32 %v2003_v1, %v1238_v28 }
 0xa52   :  { %v1243_v30 = vadd.f32 -0.28449672, %v1239_v61  ;;  %v1240_v43 = vmul.f32 %v2005_v13, %v1236_v34 }
 0xa53   :  { %v1249_v31 = vmul.f32 %v1999_v2, %v1245_v4  ;;  %v1246_v42 = vadd.f32 -0.28449672, %v1242_v32 }
 0xa54   :  { %v1247_v37 = vmul.f32 %v2001_v59, %v1243_v30  ;;  %v1244_v48 = vadd.f32 -0.28449672, %v1240_v43 }
 0xa55   :  { %v1253_v39 = vadd.f32 0.2548296, %v1249_v31  ;;  %v1250_v46 = vmul.f32 %v2003_v1, %v1246_v42 }
 0xa56   :  { %v1251_v44 = vadd.f32 0.2548296, %v1247_v37  ;;  %v1248_v55 = vmul.f32 %v2005_v13, %v1244_v48 }
 0xa57   :  { %v1257_v45 = vmul.f32 %v1999_v2, %v1253_v39  ;;  %v1254_v54 = vadd.f32 0.2548296, %v1250_v46 }
 0xa58   :  { %v1255_v50 = vmul.f32 %v2001_v59, %v1251_v44  ;;  %v1252_v60 = vadd.f32 0.2548296, %v1248_v55 }
 0xa59   :  { %v1277_v53 = vmul.f32 %v2007_v49, %v1257_v45  ;;  %v1258_v57 = vmul.f32 %v2003_v1, %v1254_v54 }
 0xa5a   :  { %v1275_v62 = vmul.f32 %v2009_v51, %v1255_v50  ;;  %v1256_v3 = vmul.f32 %v2005_v13, %v1252_v60  ;;  %v1187_v13 = vmul.f32 0.5, %v2317_v33 }
 0xa5b   :  { %v1281_v56 = vsub.f32 1.0, %v1277_v53  ;;  %v1278_v59 = vmul.f32 %v2011_v52, %v1258_v57 }
 0xa5c   :  { %v1279_v2 = vsub.f32 1.0, %v1275_v62  ;;  %v1276_v11 = vmul.f32 %v2013_v5, %v1256_v3 }
 0xa5d   :  { %v1285_v63 = vmul.f32 %v1281_v56, %v1201_v0  ;;  %v1282_v8 = vsub.f32 1.0, %v1278_v59  ;;  %v2025_v59 = vmov 0.0|0.0  }
 0xa5e   :  { %v1283_v7 = vmul.f32 %v1279_v2, %v1199_v35  ;;  %v1280_v14 = vsub.f32 1.0, %v1276_v11  ;;  %1901 = vmatprep.subr.bf16.mxu0 %v2025_v59 }
 0xa5f   :  { %v1289_v38 = vadd.f32 1.0, %v1285_v63  ;;  %v1286_v1 = vmul.f32 %v1282_v8, %v1202_v12 }
 0xa60   :  { %v1287_v17 = vadd.f32 1.0, %v1283_v7  ;;  %v1284_v19 = vmul.f32 %v1280_v14, %v1200_v16  ;;  %v1489_v16 = vlaneseq }
 0xa61   :  { %v1290_v40 = vadd.f32 1.0, %v1286_v1  ;;  %v1293_v21 = vmul.f32 %v1289_v38, %v1189_v15 }
 0xa62   :  { %v1288_v47 = vadd.f32 1.0, %v1284_v19  ;;  %v1291_v27 = vmul.f32 %v1287_v17, %v1187_v13  ;;  %v1698_v19 = vld [vmem:[%s2389_s2 + $0x2f] ss:$0 sm:$0xff] }
 0xa63   :  { %v1294_v22 = vmul.f32 %v1290_v40, %v1190_v18  ;;  %v1490_v18 = vshrl.u32 %v1489_v16, 7 }
 0xa64   :  { %v1292_v6 = vmul.f32 %v1288_v47, %v1188_v25 }
 0xa65   :  { %v1296_v61 = vpack.c.bf16 %v1294_v22, %v1293_v21  ;;  %v1493_v21 = vmul.u32 16, %v1490_v18 }
 0xa66   :  { %v1295_v4 = vpack.c.bf16 %v1292_v6, %v1291_v27 }
 0xa68   :  { %1878 = vmatprep.mubr.bf16.mxu1 %v1295_v4 }
 0xa69   :  { %1879 = vmatmul.mubr.bf16.vlgmr.msra.gmra.mrb[20].mxu1 %v1296_v61  ;;  %v1699_v61 = vld [vmem:[%s2389_s2 + $0x30] ss:$0 sm:$0xff] }
 0xb3c   :  { %v1880_v36 = vpop.f32.mrb[20].mxu1 }
 0xb3d   :  { %v1400_v28 = vpop.f32.mrb[21].mxu1  ;;  %v1409_v29 = vadd.f32 %v1880_v36, %v1689_v10  ;;  %v1495_v36 = vadd.s32 16, %v1493_v21 }
 0xb3e   :  { %v1401_v30 = vadd.f32 %v1689_v10, %v1400_v28  ;;  %v1881_v33 = vpop.f32.mrb[22].mxu1 }
 0xb3f   :  { %v1403_v31 = vpop.f32.mrb[23].mxu1  ;;  %v1412_v32 = vadd.f32 %v1881_v33, %v1689_v10  ;;  %v1417_v42 = vadd.f32 %v1409_v29, %v2248_v23 }
 0xb40   :  { %v1404_v34 = vadd.f32 %v1689_v10, %v1403_v31  ;;  %v1415_v41 = vadd.f32 %v1401_v30, %v2245_v20  ;;  %v1492_v10 = vand.u32 127, %v1489_v16 }
 0xb41   :  { %v1418_v44 = vadd.f32 %v1412_v32, %v2256_v26  ;;  %v1427_v45 = vsel %vm108_vm1, %v1417_v42, 0.0 }
 0xb42   :  { %v1421_v37 = vsel %vm108_vm1, %v1415_v41, 0.0  ;;  %v1416_v39 = vadd.f32 %v1404_v34, %v2251_v24  ;;  %vm1494_vm8 = vcmp.ge.s32.totalorder %v1492_v10, %v1493_v21  ;;  %vm1496_vm9 = vcmp.lt.s32.totalorder %v1492_v10, %v1495_v36 }
 0xb43   :  { %1422 = vadd.xlane.f32.xlu0 %v1421_v37  ;;  %v1430_v46 = vsel %vm108_vm1, %v1418_v44, 0.0  ;;  %vm1497_vm10 = vmand %vm1494_vm8, %vm1496_vm9 }
 0xb44   :  { %v1424_v43 = vsel %vm108_vm1, %v1416_v39, 0.0 }
 0xb45   :  { %1425 = vadd.xlane.f32.xlu1 %v1424_v43  ;;  %v1940_v43 = vld [vmem:[%s2387_s1 + $0xa8] sm:$0xff]  }
 0xb47   :  { %1428 = vadd.xlane.f32.xlu0 %v1427_v45 }
 0xb49   :  { %1431 = vadd.xlane.f32.xlu1 %v1430_v46 }
 0xbd0   :  { %v1423_v48 = vpop.xlane.xlu0 %1422 }
 0xbd1   :  { %v1433_v20 = vmul.f32 0.03125, %v1423_v48 }
 0xbd2   :  { %v1426_v49 = vpop.xlane.xlu1 %1425 }
 0xbd3   :  { %v1437_v50 = vsub.f32 %v1415_v41, %v1433_v20  ;;  %v1434_v51 = vmul.f32 0.03125, %v1426_v49  ;;  %v1701_v20 = vld [vmem:[%s2389_s2 + $0x31] ss:$0 sm:$0xff] }
 0xbd4   :  { %v1429_v24 = vpop.xlane.xlu0 %1428 }
 0xbd5   :  { %v1438_v53 = vsub.f32 %v1416_v39, %v1434_v51  ;;  %v1435_v23 = vmul.f32 0.03125, %v1429_v24  ;;  %v1441_v54 = vmul.f32 %v1437_v50, %v1437_v50 }
 0xbd6   :  { %v1432_v55 = vpop.xlane.xlu1 %1431 }
 0xbd7   :  { %v1439_v62 = vsub.f32 %v1417_v42, %v1435_v23  ;;  %v1436_v56 = vmul.f32 0.03125, %v1432_v55  ;;  %v1445_v26 = vsel %vm108_vm1, %v1441_v54, 0.0  ;;  %v1442_v57 = vmul.f32 %v1438_v53, %v1438_v53 }
 0xbd8   :  { %1446 = vadd.xlane.f32.xlu0 %v1445_v26  ;;  %v1498_v42 = vsel %vm1497_vm10, 0.0625, %v2022_v9 }
 0xbd9   :  { %v1440_v60 = vsub.f32 %v1418_v44, %v1436_v56  ;;  %v1448_v52 = vsel %vm108_vm1, %v1442_v57, 0.0  ;;  %v1443_v58 = vmul.f32 %v1439_v62, %v1439_v62  ;;  %v1941_v44 = vld [vmem:[%s2387_s1 + $0xb0] sm:$0xff]  }
 0xbda   :  { %1449 = vadd.xlane.f32.xlu1 %v1448_v52 }
 0xbdb   :  { %v1451_v0 = vsel %vm108_vm1, %v1443_v58, 0.0  ;;  %v1444_v2 = vmul.f32 %v1440_v60, %v1440_v60 }
 0xbdc   :  { %1452 = vadd.xlane.f32.xlu0 %v1451_v0 }
 0xbdd   :  { %v1454_v63 = vsel %vm108_vm1, %v1444_v2, 0.0 }
 0xbde   :  { %1455 = vadd.xlane.f32.xlu1 %v1454_v63 }
 0xc65   :  { %v1447_v3 = vpop.xlane.xlu0 %1446 }
 0xc66   :  { %v1457_v5 = vmul.f32 0.03125, %v1447_v3 }
 0xc67   :  { %v1450_v35 = vpop.xlane.xlu1 %1449 }
 0xc68   :  { %v1461_v7 = vadd.f32 1e-05, %v1457_v5  ;;  %v1458_v8 = vmul.f32 0.03125, %v1450_v35 }
 0xc69   :  { %v1453_v11 = vpop.xlane.xlu0 %1452 }
 0xc6a   :  { %2014 = vrsqrt.f32 %v1461_v7  ;;  %v1462_v12 = vadd.f32 1e-05, %v1458_v8  ;;  %v1459_v38 = vmul.f32 0.03125, %v1453_v11 }
 0xc6b   :  { %v1456_v1 = vpop.xlane.xlu1 %1455 }
 0xc6c   :  { %2016 = vrsqrt.f32 %v1462_v12  ;;  %v1463_v14 = vadd.f32 1e-05, %v1459_v38  ;;  %v1460_v15 = vmul.f32 0.03125, %v1456_v1 }
 0xc6e   :  { %2018 = vrsqrt.f32 %v1463_v14  ;;  %v1464_v17 = vadd.f32 1e-05, %v1460_v15 }
 0xc70   :  { %2020 = vrsqrt.f32 %v1464_v17 }
 0xc74   :  { %v2015_v40 = vpop.eup %2014 }
 0xc75   :  { %v1469_v13 = vmul.f32 %v2015_v40, %v1437_v50 }
 0xc76   :  { %v2017_v22 = vpop.eup %2016 }
 0xc77   :  { %v1470_v25 = vmul.f32 %v2017_v22, %v1438_v53  ;;  %v1477_v47 = vmul.f32 %v1698_v19, %v1469_v13 }
 0xc78   :  { %v2019_v27 = vpop.eup %2018 }
 0xc79   :  { %v1471_v6 = vmul.f32 %v2019_v27, %v1439_v62  ;;  %v1478_v4 = vmul.f32 %v1698_v19, %v1470_v25  ;;  %v1485_v30 = vadd.f32 %v1699_v61, %v1477_v47 }
 0xc7a   :  { %v2021_v28 = vpop.eup %2020 }
 0xc7b   :  { %v1472_v29 = vmul.f32 %v2021_v28, %v1440_v60  ;;  %v1486_v33 = vadd.f32 %v1699_v61, %v1478_v4  ;;  %v1479_v31 = vmul.f32 %v1698_v19, %v1471_v6 }
 0xc7d   :  { %v1902_v32 = vpack.c.bf16 %v1486_v33, %v1485_v30  ;;  %v1480_v34 = vmul.f32 %v1698_v19, %v1472_v29  ;;  %v1487_v41 = vadd.f32 %v1699_v61, %v1479_v31 }
 0xc7f   :  { %1903 = vmatpush3.bf16.msra.mxu0 %v1902_v32  ;;  %v1488_v37 = vadd.f32 %v1699_v61, %v1480_v34 }
 0xc80   :  { %1904 = vmatprep.subr.bf16.mxu0 %v2025_v59 }
 0xc81   :  { %v1905_v39 = vpack.c.bf16 %v1488_v37, %v1487_v41 }
 0xc83   :  { %1906 = vmatpush3.bf16.msra.mxu0 %v1905_v39 }
 0xc84   :  { %1893 = vmatprep.subr.bf16.mxu0 %v2022_v9 }
 0xc86   :  { %1891 = vmatmul.mubr.msk.f32.vlgmr.msra.gmra.mrb[28].mxu0 %vm108_vm1, %v1498_v42 }
 0xc87   :  { %1894 = vmatpush3.bf16.msra.mxu0 %v1940_v43  ;;  %1897 = vmatprep.mubr.msk.bf16.mxu0 %vm2023_vm2, %v2022_v9 }
 0xc88   :  { %1895 = vmatprep.subr.bf16.mxu0 %v2022_v9 }
 0xc8b   :  { %1896 = vmatpush3.bf16.msra.mxu0 %v1941_v44 }
 0xd59   :  { %v1568_v45 = vpop.f32.mrb[28].mxu0 }
 0xd5a   :  { %v1572_v46 = vpack.c.bf16 %v1568_v45, %v1568_v45  ;;  %v1892_v48 = vpop.f32.mrb[29].mxu0 }
 0xd5c   :  { %1898 = vmatmul.mubr.msk.bf16.vlgmr.msra.gmra.mrb[32].mxu0 %vm108_vm1, %v1572_v46 }
 0xe2f   :  { %v1631_v49 = vpop.f32.mrb[32].mxu0 }
 0xe30   :  { %v1632_v50 = vadd.f32 %v1701_v20, %v1631_v49  ;;  %v1899_v51 = vpop.f32.mrb[33].mxu0 }
 0xe31   :  { %v1634_v24 = vpop.f32.mrb[34].mxu0 }
 0xe32   :  { %1637 = vst [vmem:[%s2390_s3] sm:$0xff] %v1632_v50  ;;  %v1900_v9 = vpop.f32.mrb[35].mxu0 }

</bundles_post_ra>
